<compile_context>
chip_gen: v5e
topology: v5e:2x2
jax: 0.10.0
libtpu: 0.0.40
codegen_flags: <defaults>
</compile_context>

<pallas_src>
import functools
import math

import numpy as np
import jax
import jax.numpy as jnp
from jax.experimental import pallas as pl
from jax.experimental.pallas import tpu as pltpu

ROW_TILE = 128   # row block: MXU/sublane friendly on v5e/v6e/v7x
LN_EPS = 1e-5


# ------------------------------------------------------------------ utilities
def _round_up(n, m):
    return (n + m - 1) // m * m


def _pad_rows(x, rows):
    pad = rows - x.shape[0]
    if pad <= 0:
        return x
    return jnp.pad(x, ((0, pad),) + ((0, 0),) * (x.ndim - 1))


def wrap_angle(a, min_val=-math.pi, max_val=math.pi):
    return min_val + jnp.mod(a + max_val, max_val - min_val)


def angle_between_2d_vectors(ctr_vector, nbr_vector):
    return jnp.arctan2(
        ctr_vector[..., 0] * nbr_vector[..., 1] - ctr_vector[..., 1] * nbr_vector[..., 0],
        (ctr_vector[..., :2] * nbr_vector[..., :2]).sum(axis=-1),
    )


# ------------------------------------------------------- in-kernel helpers
def _ln(x, g, b, eps):
    mu = jnp.mean(x, axis=-1, keepdims=True)
    xc = x - mu
    var = jnp.mean(xc * xc, axis=-1, keepdims=True)
    return xc * jax.lax.rsqrt(var + eps) * g + b


def _sigmoid(y):
    # numerically stable logistic (never exp of a large positive value)
    pos = y >= 0.0
    z = jnp.exp(jnp.where(pos, -y, y))
    return jnp.where(pos, 1.0 / (1.0 + z), z / (1.0 + z))


def _bdot(a_f32, w_bf16):
    # bf16 MXU matmul with f32 accumulation
    return jnp.dot(a_f32.astype(jnp.bfloat16), w_bf16,
                   preferred_element_type=jnp.float32)


# ------------------------------------------------------------- Pallas kernels
def _ln_linear_kernel(x_ref, g_ref, b_ref, w_ref, bias_ref, o_ref, *, eps, relu_after_ln):
    """y = LN(x) [-> relu] @ W + b   (fused pre-norm + projection)."""
    xn = _ln(x_ref[...], g_ref[...], b_ref[...], eps)
    if relu_after_ln:
        xn = jnp.maximum(xn, 0.0)
    o_ref[...] = _bdot(xn, w_ref[...]) + bias_ref[...]


def _fourier_kernel(feat_ref, cat_ref, w1_ref, b1_ref, g1_ref, bb1_ref,
                    w2_ref, b2_ref, og_ref, ob_ref, ow_ref, obias_ref, o_ref,
                    *, D, eps):
    """Whole FourierEmbedding (continuous path) in one kernel:
       sum_i Lin2(ReLU(LN(Lin1(feat_i)))) + cat  -> LN -> ReLU -> Lin_out."""
    acc = cat_ref[...]
    for i in range(D):                               # static, D in {1,3,4}
        f = feat_ref[i]                              # [TM, F1P]
        h = _bdot(f, w1_ref[i]) + b1_ref[i]
        h = jnp.maximum(_ln(h, g1_ref[i], bb1_ref[i], eps), 0.0)
        h = _bdot(h, w2_ref[i]) + b2_ref[i]
        acc = acc + h
    y = jnp.maximum(_ln(acc, og_ref[...], ob_ref[...], eps), 0.0)
    o_ref[...] = _bdot(y, ow_ref[...]) + obias_ref[...]


def _attn_post_kernel(agg_ref, gx_ref, s_ref, xres_ref,
                      wga_ref, bg_ref, wout_ref, bout_ref, ln_ref,
                      w1_ref, b1_ref, w2_ref, b2_ref, o_ref, *, eps):
    """Attention epilogue + FFN fused:
       g   = sigmoid(agg @ Wg_a + gx + bg)          (gx = LN(x_dst) @ Wg_x, precomputed)
       upd = agg + g * (s - agg)
       x   = x_res + LN(upd @ Wout + bout)
       out = x + LN(FFN(LN(x)))"""
    agg = agg_ref[...]
    g = _sigmoid(_bdot(agg, wga_ref[...]) + gx_ref[...] + bg_ref[...])
    upd = agg + g * (s_ref[...] - agg)
    attn_out = _bdot(upd, wout_ref[...]) + bout_ref[...]
    x = xres_ref[...] + _ln(attn_out, ln_ref[0], ln_ref[1], eps)
    ff_in = _ln(x, ln_ref[2], ln_ref[3], eps)
    h = jnp.maximum(_bdot(ff_in, w1_ref[...]) + b1_ref[...], 0.0)
    h = _bdot(h, w2_ref[...]) + b2_ref[...]
    o_ref[...] = x + _ln(h, ln_ref[4], ln_ref[5], eps)


# --------------------------------------------------------------- wrappers
def ln_linear(x_pad, g, b, w, bias, *, relu_after_ln=False):
    """x_pad: [Np, H] with Np a multiple of ROW_TILE (padded once upstream)."""
    Np, H = x_pad.shape
    W = w.shape[1]
    return pl.pallas_call(
        functools.partial(_ln_linear_kernel, eps=LN_EPS, relu_after_ln=relu_after_ln),
        out_shape=jax.ShapeDtypeStruct((Np, W), jnp.float32),
        grid=(Np // ROW_TILE,),
        in_specs=[
            pl.BlockSpec((ROW_TILE, H), lambda i: (i, 0)),
            pl.BlockSpec((1, H), lambda i: (0, 0)),
            pl.BlockSpec((1, H), lambda i: (0, 0)),
            pl.BlockSpec((H, W), lambda i: (0, 0)),
            pl.BlockSpec((1, W), lambda i: (0, 0)),
        ],
        out_specs=pl.BlockSpec((ROW_TILE, W), lambda i: (i, 0)),
        compiler_params=pltpu.CompilerParams(dimension_semantics=("parallel",)),
    )(x_pad, g, b, w, bias)


def _fourier_features(cont_pad, freqs, F1P):
    # cont_pad [Np, D], freqs [D, F]  ->  dim-major [D, Np, F1P] (zero padded cols)
    ang = cont_pad[:, :, None] * freqs[None] * (2.0 * math.pi)          # [Np, D, F]
    feat = jnp.concatenate([jnp.cos(ang), jnp.sin(ang), cont_pad[:, :, None]], axis=-1)
    F1 = feat.shape[-1]
    feat = jnp.pad(feat, ((0, 0), (0, 0), (0, F1P - F1)))
    return jnp.transpose(feat, (1, 0, 2))


def fourier_embedding(p, cont_pad, cat_pad):
    H = p["out_w"].shape[0]
    D = p["input_dim"]
    if D == 0:   # categorical-only path: LN -> ReLU -> Linear
        return ln_linear(cat_pad, p["out_ln_g"], p["out_ln_b"],
                         p["out_w"], p["out_b"], relu_after_ln=True)
    F1P = p["F1P"]
    Np = cat_pad.shape[0]
    feat = _fourier_features(cont_pad, p["freqs"], F1P)                 # [D, Np, F1P]
    return pl.pallas_call(
        functools.partial(_fourier_kernel, D=D, eps=LN_EPS),
        out_shape=jax.ShapeDtypeStruct((Np, H), jnp.float32),
        grid=(Np // ROW_TILE,),
        in_specs=[
            pl.BlockSpec((D, ROW_TILE, F1P), lambda i: (0, i, 0)),
            pl.BlockSpec((ROW_TILE, H), lambda i: (i, 0)),
            pl.BlockSpec((D, F1P, H), lambda i: (0, 0, 0)),
            pl.BlockSpec((D, 1, H), lambda i: (0, 0, 0)),
            pl.BlockSpec((D, 1, H), lambda i: (0, 0, 0)),
            pl.BlockSpec((D, 1, H), lambda i: (0, 0, 0)),
            pl.BlockSpec((D, H, H), lambda i: (0, 0, 0)),
            pl.BlockSpec((D, 1, H), lambda i: (0, 0, 0)),
            pl.BlockSpec((1, H), lambda i: (0, 0)),
            pl.BlockSpec((1, H), lambda i: (0, 0)),
            pl.BlockSpec((H, H), lambda i: (0, 0)),
            pl.BlockSpec((1, H), lambda i: (0, 0)),
        ],
        out_specs=pl.BlockSpec((ROW_TILE, H), lambda i: (i, 0)),
        compiler_params=pltpu.CompilerParams(dimension_semantics=("parallel",)),
    )(feat, cat_pad, p["w1s"], p["b1s"], p["g1s"], p["bb1s"], p["w2s"], p["b2s"],
      p["out_ln_g"], p["out_ln_b"], p["out_w"], p["out_b"])


def attn_post(p, agg_pad, gx, s, x_res):
    Np, H = x_res.shape
    D = agg_pad.shape[1]
    F = p["ff_w1"].shape[1]
    return pl.pallas_call(
        functools.partial(_attn_post_kernel, eps=LN_EPS),
        out_shape=jax.ShapeDtypeStruct((Np, H), jnp.float32),
        grid=(Np // ROW_TILE,),
        in_specs=[
            pl.BlockSpec((ROW_TILE, D), lambda i: (i, 0)),
            pl.BlockSpec((ROW_TILE, D), lambda i: (i, 0)),
            pl.BlockSpec((ROW_TILE, D), lambda i: (i, 0)),
            pl.BlockSpec((ROW_TILE, H), lambda i: (i, 0)),
            pl.BlockSpec((D, D), lambda i: (0, 0)),
            pl.BlockSpec((1, D), lambda i: (0, 0)),
            pl.BlockSpec((D, H), lambda i: (0, 0)),
            pl.BlockSpec((1, H), lambda i: (0, 0)),
            pl.BlockSpec((6, 1, H), lambda i: (0, 0, 0)),
            pl.BlockSpec((H, F), lambda i: (0, 0)),
            pl.BlockSpec((1, F), lambda i: (0, 0)),
            pl.BlockSpec((F, H), lambda i: (0, 0)),
            pl.BlockSpec((1, H), lambda i: (0, 0)),
        ],
        out_specs=pl.BlockSpec((ROW_TILE, H), lambda i: (i, 0)),
        compiler_params=pltpu.CompilerParams(dimension_semantics=("parallel",)),
    )(agg_pad, gx, s, x_res, p["wg_a"], p["bg"], p["wout"], p["bout"],
      p["ln_stack"], p["ff_w1"], p["ff_b1"], p["ff_w2"], p["ff_b2"])


# ---------------------------------------------------------- parameter init
def init_fourier(key, input_dim, hidden_dim, num_freq_bands):
    H = hidden_dim
    F1 = num_freq_bands * 2 + 1
    F1P = _round_up(F1, 8)
    p = {"input_dim": input_dim, "F1P": F1P}
    ks = jax.random.split(key, 2 * max(input_dim, 1) + 2)
    if input_dim > 0:
        p["freqs"] = jax.random.normal(ks[0], (input_dim, num_freq_bands), jnp.float32)
        w1s, w2s = [], []
        for i in range(input_dim):
            k1, k2 = jax.random.split(ks[1 + i], 2)
            w1 = jax.random.normal(k1, (F1, H), jnp.float32) * 0.1
            w1s.append(jnp.pad(w1, ((0, F1P - F1), (0, 0))))
            w2s.append(jax.random.normal(k2, (H, H), jnp.float32) * 0.1)
        p["w1s"] = jnp.stack(w1s).astype(jnp.bfloat16)                # [D, F1P, H]
        p["w2s"] = jnp.stack(w2s).astype(jnp.bfloat16)                # [D, H, H]
        p["b1s"] = jnp.zeros((input_dim, 1, H), jnp.float32)
        p["g1s"] = jnp.ones((input_dim, 1, H), jnp.float32)
        p["bb1s"] = jnp.zeros((input_dim, 1, H), jnp.float32)
        p["b2s"] = jnp.zeros((input_dim, 1, H), jnp.float32)
    p["out_ln_g"] = jnp.ones((1, H), jnp.float32)
    p["out_ln_b"] = jnp.zeros((1, H), jnp.float32)
    p["out_w"] = (jax.random.normal(ks[-1], (H, H), jnp.float32) * 0.1).astype(jnp.bfloat16)
    p["out_b"] = jnp.zeros((1, H), jnp.float32)
    return p


def init_attention(key, hidden_dim, num_heads, head_dim, bipartite):
    H = hidden_dim
    D = num_heads * head_dim
    ks = jax.random.split(key, 8)

    def w(k, shape):
        return (jax.random.normal(k, shape, jnp.float32) * 0.1).astype(jnp.bfloat16)

    p = {
        "pre_src_g": jnp.ones((1, H), jnp.float32), "pre_src_b": jnp.zeros((1, H), jnp.float32),
        "pre_r_g": jnp.ones((1, H), jnp.float32), "pre_r_b": jnp.zeros((1, H), jnp.float32),
        # [Kr | Vr] fused projection of the relative positional embedding
        "r_w": w(ks[2], (H, 2 * D)), "r_b": jnp.zeros((1, 2 * D), jnp.float32),
        # gating / output / FFN
        "wg_a": w(ks[3], (D, D)), "bg": jnp.zeros((1, D), jnp.float32),
        "wout": w(ks[4], (D, H)), "bout": jnp.zeros((1, H), jnp.float32),
        # [post_g, post_b, ffpre_g, ffpre_b, ffpost_g, ffpost_b]
        "ln_stack": jnp.stack([jnp.ones((1, H)), jnp.zeros((1, H)), jnp.ones((1, H)),
                               jnp.zeros((1, H)), jnp.ones((1, H)), jnp.zeros((1, H))]
                              ).astype(jnp.float32),
        "ff_w1": w(ks[5], (H, 4 * H)), "ff_b1": jnp.zeros((1, 4 * H), jnp.float32),
        "ff_w2": w(ks[6], (4 * H, H)), "ff_b2": jnp.zeros((1, H), jnp.float32),
    }
    if bipartite:
        p["pre_dst_g"] = jnp.ones((1, H), jnp.float32)
        p["pre_dst_b"] = jnp.zeros((1, H), jnp.float32)
        p["dst_w"] = w(ks[0], (H, 3 * D))          # [Q | S | Gx]
        p["dst_b"] = jnp.zeros((1, 3 * D), jnp.float32)
        p["src_w"] = w(ks[1], (H, 2 * D))          # [K | V]
        p["src_b"] = jnp.zeros((1, 2 * D), jnp.float32)
    else:
        p["x_w"] = w(ks[0], (H, 5 * D))            # [Q | K | V | S | Gx]  (160 lanes)
        p["x_b"] = jnp.zeros((1, 5 * D), jnp.float32)
    return p


def init_params(key, hidden_dim, num_freq_bands, num_layers, num_heads, head_dim):
    ks = jax.random.split(key, 10)
    params = dict(
        type_pt_emb=jax.random.normal(ks[0], (17, hidden_dim), jnp.float32) * 0.1,
        side_pt_emb=jax.random.normal(ks[1], (3, hidden_dim), jnp.float32) * 0.1,
        type_pl_emb=jax.random.normal(ks[2], (4, hidden_dim), jnp.float32) * 0.1,
        int_pl_emb=jax.random.normal(ks[3], (3, hidden_dim), jnp.float32) * 0.1,
        type_pl2pl_emb=jax.random.normal(ks[4], (5, hidden_dim), jnp.float32) * 0.1,
        x_pt_emb=init_fourier(ks[5], 1, hidden_dim, num_freq_bands),   # input_dim==2 -> x_pt dim 1
        x_pl_emb=init_fourier(ks[6], 0, hidden_dim, num_freq_bands),   # input_dim==2 -> x_pl dim 0
        r_pt2pl_emb=init_fourier(ks[7], 3, hidden_dim, num_freq_bands),
        r_pl2pl_emb=init_fourier(ks[8], 3, hidden_dim, num_freq_bands),
    )
    lk = jax.random.split(ks[9], num_layers * 2)
    params["pt2pl_layers"] = [
        init_attention(lk[2 * i], hidden_dim, num_heads, head_dim, bipartite=True)
        for i in range(num_layers)]
    params["pl2pl_layers"] = [
        init_attention(lk[2 * i + 1], hidden_dim, num_heads, head_dim, bipartite=False)
        for i in range(num_layers)]
    return params


# ------------------------------------------------------------ AttentionLayer
def attention_layer(p, x, r_pad, edge_index, *, num_heads, head_dim, bipartite, n_dst):
    src, dst = edge_index[0], edge_index[1]
    D = num_heads * head_dim

    if bipartite:
        x_src_pad, x_dst_pad = x
        proj_dst = ln_linear(x_dst_pad, p["pre_dst_g"], p["pre_dst_b"], p["dst_w"], p["dst_b"])
        proj_src = ln_linear(x_src_pad, p["pre_src_g"], p["pre_src_b"], p["src_w"], p["src_b"])
        q, s, gx = proj_dst[:, :D], proj_dst[:, D:2 * D], proj_dst[:, 2 * D:3 * D]
        k, v = proj_src[:, :D], proj_src[:, D:2 * D]
        x_res = x_dst_pad
    else:
        proj = ln_linear(x, p["pre_src_g"], p["pre_src_b"], p["x_w"], p["x_b"])
        q, k, v = proj[:, :D], proj[:, D:2 * D], proj[:, 2 * D:3 * D]
        s, gx = proj[:, 3 * D:4 * D], proj[:, 4 * D:5 * D]
        x_res = x

    proj_r = ln_linear(r_pad, p["pre_r_g"], p["pre_r_b"], p["r_w"], p["r_b"])

    E = src.shape[0]
    k_r = proj_r[:E, :D]
    v_r = proj_r[:E, D:2 * D]

    # TODO(synk): per-edge gather + per-destination segment softmax / scatter-add is
    # data-dependent indexing; kept in plain JAX (jax.ops.segment_*) rather than a
    # PrefetchScalarGridSpec gather kernel.
    nH, dH = num_heads, head_dim
    scale = dH ** -0.5
    q_i = q[dst].reshape(E, nH, dH)
    k_j = (k[src] + k_r).reshape(E, nH, dH)
    v_j = (v[src] + v_r).reshape(E, nH, dH)
    sim = jnp.sum(q_i * k_j, axis=-1) * scale                          # [E, nH]
    seg_max = jax.ops.segment_max(sim, dst, num_segments=n_dst)
    seg_max = jnp.where(jnp.isfinite(seg_max), seg_max, 0.0)           # empty-segment guard
    e = jnp.exp(sim - seg_max[dst])
    denom = jax.ops.segment_sum(e, dst, num_segments=n_dst)
    attn = e / (denom[dst] + 1e-16)
    msg = v_j * attn[..., None]
    agg = jax.ops.segment_sum(msg, dst, num_segments=n_dst).reshape(n_dst, D)
    agg_pad = _pad_rows(agg, x_res.shape[0])

    return attn_post(p, agg_pad, gx, s, x_res)


# ------------------------------------------------------------- full encoder
def qcnet_map_encoder_forward(params, data, *, input_dim, hidden_dim,
                              num_historical_steps, num_layers, num_heads, head_dim):
    pos_pt = data["map_point"]["position"][:, :input_dim]
    orient_pt = data["map_point"]["orientation"]
    pos_pl = data["map_polygon"]["position"][:, :input_dim]
    orient_pl = data["map_polygon"]["orientation"]
    orient_vector_pl = jnp.stack([jnp.cos(orient_pl), jnp.sin(orient_pl)], axis=-1)

    N_pt, N_pl = pos_pt.shape[0], pos_pl.shape[0]
    Np_pt = _round_up(N_pt, ROW_TILE)
    Np_pl = _round_up(N_pl, ROW_TILE)

    # categorical lookups (plain JAX) -> summed once, padded once
    cat_pt = (jnp.take(params["type_pt_emb"], data["map_point"]["type"], axis=0)
              + jnp.take(params["side_pt_emb"], data["map_point"]["side"], axis=0))
    cat_pl = (jnp.take(params["type_pl_emb"], data["map_polygon"]["type"], axis=0)
              + jnp.take(params["int_pl_emb"], data["map_polygon"]["is_intersection"], axis=0))
    x_pt_cont = data["map_point"]["magnitude"][:, None]                # input_dim == 2 path

    x_pt_p = fourier_embedding(params["x_pt_emb"],
                               _pad_rows(x_pt_cont.astype(jnp.float32), Np_pt),
                               _pad_rows(cat_pt, Np_pt))
    x_pl_p = fourier_embedding(params["x_pl_emb"], None, _pad_rows(cat_pl, Np_pl))

    # pt -> pl relative geometry
    ei_pt2pl = data["pt2pl_edge_index"]
    s0, d0 = ei_pt2pl[0], ei_pt2pl[1]
    rel_pos = pos_pt[s0] - pos_pl[d0]
    rel_orient = wrap_angle(orient_pt[s0] - orient_pl[d0])
    r_pt2pl_cont = jnp.stack([
        jnp.linalg.norm(rel_pos[:, :2], axis=-1),
        angle_between_2d_vectors(orient_vector_pl[d0], rel_pos[:, :2]),
        rel_orient], axis=-1)
    Ep0 = _round_up(r_pt2pl_cont.shape[0], ROW_TILE)
    r_pt2pl_p = fourier_embedding(params["r_pt2pl_emb"],
                                  _pad_rows(r_pt2pl_cont, Ep0),
                                  jnp.zeros((Ep0, hidden_dim), jnp.float32))

    # pl -> pl relative geometry (edge set already merged on host)
    ei_pl2pl = data["pl2pl_edge_index"]
    type_pl2pl = data["pl2pl_type"]
    s1, d1 = ei_pl2pl[0], ei_pl2pl[1]
    rel_pos2 = pos_pl[s1] - pos_pl[d1]
    rel_orient2 = wrap_angle(orient_pl[s1] - orient_pl[d1])
    r_pl2pl_cont = jnp.stack([
        jnp.linalg.norm(rel_pos2[:, :2], axis=-1),
        angle_between_2d_vectors(orient_vector_pl[d1], rel_pos2[:, :2]),
        rel_orient2], axis=-1)
    Ep1 = _round_up(r_pl2pl_cont.shape[0], ROW_TILE)
    cat_pl2pl = jnp.take(params["type_pl2pl_emb"], type_pl2pl, axis=0)
    r_pl2pl_p = fourier_embedding(params["r_pl2pl_emb"],
                                  _pad_rows(r_pl2pl_cont, Ep1),
                                  _pad_rows(cat_pl2pl, Ep1))

    # attention stack (padded activations flow through all layers; padded rows
    # never feed the segment softmax because edge indices only touch real rows)
    for i in range(num_layers):
        x_pl_p = attention_layer(params["pt2pl_layers"][i], (x_pt_p, x_pl_p),
                                 r_pt2pl_p, ei_pt2pl,
                                 num_heads=num_heads, head_dim=head_dim,
                                 bipartite=True, n_dst=N_pl)
        x_pl_p = attention_layer(params["pl2pl_layers"][i], x_pl_p,
                                 r_pl2pl_p, ei_pl2pl,
                                 num_heads=num_heads, head_dim=head_dim,
                                 bipartite=False, n_dst=N_pl)

    x_pt = x_pt_p[:N_pt]
    x_pl = x_pl_p[:N_pl]
    x_pl = jnp.repeat(x_pl, num_historical_steps, axis=0).reshape(
        -1, num_historical_steps, hidden_dim)
    return {"x_pt": x_pt, "x_pl": x_pl}


# -------------------------------------------------- host-side graph building
# TODO(synk): radius_graph / merge_edges produce data-dependent edge counts;
# implemented as host numpy glue (not part of the TPU hot path).
def radius_graph_np(pos2d, radius):
    n = pos2d.shape[0]
    d = np.linalg.norm(pos2d[:, None, :] - pos2d[None, :, :], axis=-1)
    src, dst = np.nonzero((d <= radius) & ~np.eye(n, dtype=bool))
    return np.stack([src, dst], axis=0).astype(np.int32)


def merge_edges_np(edge_indices, edge_attrs, num_nodes):
    ei = np.concatenate(edge_indices, axis=1)
    ea = np.concatenate(edge_attrs, axis=0)
    keys = ei[0].astype(np.int64) * num_nodes + ei[1].astype(np.int64)
    order = np.argsort(keys, kind="stable")
    keys, ei, ea = keys[order], ei[:, order], ea[order]
    uniq, inv = np.unique(keys, return_inverse=True)
    out_ei = np.zeros((2, uniq.shape[0]), np.int32)
    out_ea = np.zeros((uniq.shape[0],), ea.dtype)
    np.maximum.at(out_ea, inv, ea)                       # reduce='max'
    out_ei[0] = (uniq // num_nodes).astype(np.int32)
    out_ei[1] = (uniq % num_nodes).astype(np.int32)
    return out_ei, out_ea


# --------------------------------------------------------------------- main
if __name__ == "__main__":
    # module hyper-params (small, consistent with the PyTorch __init__)
    dataset = "argoverse_v2"
    input_dim = 2
    hidden_dim = 32
    num_historical_steps = 4
    pl2pl_radius = 3.0
    num_freq_bands = 4
    num_layers = 2
    num_heads = 2
    head_dim = 16
    N_pt, N_pl = 24, 6

    key = jax.random.PRNGKey(0)
    kd, kp = jax.random.split(key)
    dk = jax.random.split(kd, 12)

    data = {
        "map_point": {
            "position": jax.random.uniform(dk[0], (N_pt, 3), jnp.float32, 0.0, 5.0),
            "orientation": jax.random.uniform(dk[1], (N_pt,), jnp.float32, -math.pi, math.pi),
            "magnitude": jax.random.uniform(dk[2], (N_pt,), jnp.float32, 0.0, 2.0),
            "type": jax.random.randint(dk[3], (N_pt,), 0, 17, jnp.int32),
            "side": jax.random.randint(dk[4], (N_pt,), 0, 3, jnp.int32),
        },
        "map_polygon": {
            "position": jax.random.uniform(dk[5], (N_pl, 3), jnp.float32, 0.0, 5.0),
            "orientation": jax.random.uniform(dk[6], (N_pl,), jnp.float32, -math.pi, math.pi),
            "type": jax.random.randint(dk[7], (N_pl,), 0, 4, jnp.int32),
            "is_intersection": jax.random.randint(dk[8], (N_pl,), 0, 3, jnp.int32),
        },
    }
    # point -> polygon membership edges
    pt2pl_edge_index = jnp.stack([jnp.arange(N_pt, dtype=jnp.int32),
                                  jnp.arange(N_pt, dtype=jnp.int32) % N_pl], axis=0)
    # given pl->pl edges with types, merged with the radius graph (host glue)
    given_ei = np.array([[0, 1, 2, 3, 4, 5],
                         [1, 2, 3, 4, 5, 0]], dtype=np.int32)
    given_type = np.asarray(jax.random.randint(dk[9], (6,), 0, 5, jnp.int32)).astype(np.uint8)
    pos_pl_np = np.asarray(data["map_polygon"]["position"][:, :2])
    radius_ei = radius_graph_np(pos_pl_np, pl2pl_radius)
    radius_type = np.zeros((radius_ei.shape[1],), dtype=np.uint8)
    merged_ei, merged_type = merge_edges_np([radius_ei, given_ei], [radius_type, given_type], N_pl)

    data["pt2pl_edge_index"] = pt2pl_edge_index
    data["pl2pl_edge_index"] = jnp.asarray(merged_ei, jnp.int32)
    data["pl2pl_type"] = jnp.asarray(merged_type.astype(np.int32))

    params = init_params(kp, hidden_dim, num_freq_bands, num_layers, num_heads, head_dim)

    out = qcnet_map_encoder_forward(
        params, data,
        input_dim=input_dim, hidden_dim=hidden_dim,
        num_historical_steps=num_historical_steps,
        num_layers=num_layers, num_heads=num_heads, head_dim=head_dim)

    jax.block_until_ready(out)
    assert out["x_pt"].shape == (N_pt, hidden_dim)
    assert out["x_pl"].shape == (N_pl, num_historical_steps, hidden_dim)
    assert bool(jnp.all(jnp.isfinite(out["x_pt"]))) and bool(jnp.all(jnp.isfinite(out["x_pl"])))
    print("KERNEL_OK")
</pallas_src>

<mosaic_0001>
module attributes {stable_mosaic.version = 11 : i64} {
  func.func @_fourier_kernel(%arg0: i32, %arg1: memref<1x128x16xf32, #tpu.memory_space<vmem>>, %arg2: memref<128x32xf32, #tpu.memory_space<vmem>>, %arg3: memref<1x16x32xbf16, #tpu.memory_space<vmem>>, %arg4: memref<1x1x32xf32, #tpu.memory_space<vmem>>, %arg5: memref<1x1x32xf32, #tpu.memory_space<vmem>>, %arg6: memref<1x1x32xf32, #tpu.memory_space<vmem>>, %arg7: memref<1x32x32xbf16, #tpu.memory_space<vmem>>, %arg8: memref<1x1x32xf32, #tpu.memory_space<vmem>>, %arg9: memref<1x32xf32, #tpu.memory_space<vmem>>, %arg10: memref<1x32xf32, #tpu.memory_space<vmem>>, %arg11: memref<32x32xbf16, #tpu.memory_space<vmem>>, %arg12: memref<1x32xf32, #tpu.memory_space<vmem>>, %arg13: memref<128x32xf32, #tpu.memory_space<vmem>>) attributes {dimension_semantics = [#tpu.dimension_semantics<parallel>], iteration_bounds = array<i64: 1>, scalar_prefetch = 0 : i64, scratch_operands = 0 : i64, tpu.core_type = #tpu.core_type<tc>, window_params = [{transform_indices = @transform_0, window_bounds = array<i64: 1, 128, 16>}, {transform_indices = @transform_1, window_bounds = array<i64: 128, 32>}, {pipeline_mode = #tpu.pipeline_mode<synchronous>, transform_indices = @transform_2, window_bounds = array<i64: 1, 16, 32>}, {pipeline_mode = #tpu.pipeline_mode<synchronous>, transform_indices = @transform_3, window_bounds = array<i64: 1, 1, 32>}, {pipeline_mode = #tpu.pipeline_mode<synchronous>, transform_indices = @transform_4, window_bounds = array<i64: 1, 1, 32>}, {pipeline_mode = #tpu.pipeline_mode<synchronous>, transform_indices = @transform_5, window_bounds = array<i64: 1, 1, 32>}, {pipeline_mode = #tpu.pipeline_mode<synchronous>, transform_indices = @transform_6, window_bounds = array<i64: 1, 32, 32>}, {pipeline_mode = #tpu.pipeline_mode<synchronous>, transform_indices = @transform_7, window_bounds = array<i64: 1, 1, 32>}, {pipeline_mode = #tpu.pipeline_mode<synchronous>, transform_indices = @transform_8, window_bounds = array<i64: 1, 32>}, {pipeline_mode = #tpu.pipeline_mode<synchronous>, transform_indices = @transform_9, window_bounds = array<i64: 1, 32>}, {pipeline_mode = #tpu.pipeline_mode<synchronous>, transform_indices = @transform_10, window_bounds = array<i64: 32, 32>}, {pipeline_mode = #tpu.pipeline_mode<synchronous>, transform_indices = @transform_11, window_bounds = array<i64: 1, 32>}, {transform_indices = @transform_12, window_bounds = array<i64: 128, 32>}]} {
    %c0 = arith.constant 0 : index
    %c0_0 = arith.constant 0 : index
    %0 = vector.load %arg2[%c0, %c0_0] : memref<128x32xf32, #tpu.memory_space<vmem>>, vector<128x32xf32>
    %c0_1 = arith.constant 0 : index
    %c0_2 = arith.constant 0 : index
    %c0_3 = arith.constant 0 : index
    %1 = vector.load %arg1[%c0_1, %c0_2, %c0_3] : memref<1x128x16xf32, #tpu.memory_space<vmem>>, vector<1x128x16xf32>
    %2 = vector.shape_cast %1 : vector<1x128x16xf32> to vector<128x16xf32>
    %c0_4 = arith.constant 0 : index
    %c0_5 = arith.constant 0 : index
    %c0_6 = arith.constant 0 : index
    %3 = vector.load %arg3[%c0_4, %c0_5, %c0_6] : memref<1x16x32xbf16, #tpu.memory_space<vmem>>, vector<1x16x32xbf16>
    %4 = vector.shape_cast %3 : vector<1x16x32xbf16> to vector<16x32xbf16>
    %5 = arith.truncf %2 : vector<128x16xf32> to vector<128x16xbf16>
    %cst = arith.constant dense<0.000000e+00> : vector<128x32xf32>
    %6 = tpu.matmul %5, %4, %cst {dimension_numbers = #tpu.dot_dimension_numbers<[1], [0], [0], [1], [0, 0, 1, 1], [], []>} : vector<128x16xbf16>, vector<16x32xbf16>, vector<128x32xf32> -> vector<128x32xf32>
    %c0_7 = arith.constant 0 : index
    %c0_8 = arith.constant 0 : index
    %c0_9 = arith.constant 0 : index
    %7 = vector.load %arg4[%c0_7, %c0_8, %c0_9] : memref<1x1x32xf32, #tpu.memory_space<vmem>>, vector<1x1x32xf32>
    %8 = vector.shape_cast %7 : vector<1x1x32xf32> to vector<1x32xf32>
    %9 = vector.broadcast %8 : vector<1x32xf32> to vector<128x32xf32>
    %10 = arith.addf %6, %9 : vector<128x32xf32>
    %c0_10 = arith.constant 0 : index
    %c0_11 = arith.constant 0 : index
    %c0_12 = arith.constant 0 : index
    %11 = vector.load %arg5[%c0_10, %c0_11, %c0_12] : memref<1x1x32xf32, #tpu.memory_space<vmem>>, vector<1x1x32xf32>
    %12 = vector.shape_cast %11 : vector<1x1x32xf32> to vector<1x32xf32>
    %c0_13 = arith.constant 0 : index
    %c0_14 = arith.constant 0 : index
    %c0_15 = arith.constant 0 : index
    %13 = vector.load %arg6[%c0_13, %c0_14, %c0_15] : memref<1x1x32xf32, #tpu.memory_space<vmem>>, vector<1x1x32xf32>
    %14 = vector.shape_cast %13 : vector<1x1x32xf32> to vector<1x32xf32>
    %cst_16 = arith.constant dense<0.000000e+00> : vector<128xf32>
    %15 = vector.multi_reduction <add>, %10, %cst_16 [1] : vector<128x32xf32> to vector<128xf32>
    %16 = vector.shape_cast %15 : vector<128xf32> to vector<128x1xf32>
    %cst_17 = arith.constant 3.200000e+01 : f32
    %17 = vector.broadcast %cst_17 : f32 to vector<128x1xf32>
    %18 = arith.divf %16, %17 : vector<128x1xf32>
    %19 = vector.broadcast %18 : vector<128x1xf32> to vector<128x32xf32>
    %20 = arith.subf %10, %19 : vector<128x32xf32>
    %21 = arith.mulf %20, %20 : vector<128x32xf32>
    %cst_18 = arith.constant dense<0.000000e+00> : vector<128xf32>
    %22 = vector.multi_reduction <add>, %21, %cst_18 [1] : vector<128x32xf32> to vector<128xf32>
    %23 = vector.shape_cast %22 : vector<128xf32> to vector<128x1xf32>
    %cst_19 = arith.constant 3.200000e+01 : f32
    %24 = vector.broadcast %cst_19 : f32 to vector<128x1xf32>
    %25 = arith.divf %23, %24 : vector<128x1xf32>
    %cst_20 = arith.constant 9.99999974E-6 : f32
    %26 = vector.broadcast %cst_20 : f32 to vector<128x1xf32>
    %27 = arith.addf %25, %26 : vector<128x1xf32>
    %28 = math.rsqrt %27 : vector<128x1xf32>
    %29 = vector.broadcast %28 : vector<128x1xf32> to vector<128x32xf32>
    %30 = arith.mulf %20, %29 : vector<128x32xf32>
    %31 = vector.broadcast %12 : vector<1x32xf32> to vector<128x32xf32>
    %32 = arith.mulf %30, %31 : vector<128x32xf32>
    %33 = vector.broadcast %14 : vector<1x32xf32> to vector<128x32xf32>
    %34 = arith.addf %32, %33 : vector<128x32xf32>
    %cst_21 = arith.constant 0.000000e+00 : f32
    %35 = vector.broadcast %cst_21 : f32 to vector<128x32xf32>
    %36 = arith.maximumf %34, %35 : vector<128x32xf32>
    %c0_22 = arith.constant 0 : index
    %c0_23 = arith.constant 0 : index
    %c0_24 = arith.constant 0 : index
    %37 = vector.load %arg7[%c0_22, %c0_23, %c0_24] : memref<1x32x32xbf16, #tpu.memory_space<vmem>>, vector<1x32x32xbf16>
    %38 = vector.shape_cast %37 : vector<1x32x32xbf16> to vector<32x32xbf16>
    %39 = arith.truncf %36 : vector<128x32xf32> to vector<128x32xbf16>
    %cst_25 = arith.constant dense<0.000000e+00> : vector<128x32xf32>
    %40 = tpu.matmul %39, %38, %cst_25 {dimension_numbers = #tpu.dot_dimension_numbers<[1], [0], [0], [1], [0, 0, 1, 1], [], []>} : vector<128x32xbf16>, vector<32x32xbf16>, vector<128x32xf32> -> vector<128x32xf32>
    %c0_26 = arith.constant 0 : index
    %c0_27 = arith.constant 0 : index
    %c0_28 = arith.constant 0 : index
    %41 = vector.load %arg8[%c0_26, %c0_27, %c0_28] : memref<1x1x32xf32, #tpu.memory_space<vmem>>, vector<1x1x32xf32>
    %42 = vector.shape_cast %41 : vector<1x1x32xf32> to vector<1x32xf32>
    %43 = vector.broadcast %42 : vector<1x32xf32> to vector<128x32xf32>
    %44 = arith.addf %40, %43 : vector<128x32xf32>
    %45 = arith.addf %0, %44 : vector<128x32xf32>
    %c0_29 = arith.constant 0 : index
    %c0_30 = arith.constant 0 : index
    %46 = vector.load %arg9[%c0_29, %c0_30] : memref<1x32xf32, #tpu.memory_space<vmem>>, vector<1x32xf32>
    %c0_31 = arith.constant 0 : index
    %c0_32 = arith.constant 0 : index
    %47 = vector.load %arg10[%c0_31, %c0_32] : memref<1x32xf32, #tpu.memory_space<vmem>>, vector<1x32xf32>
    %cst_33 = arith.constant dense<0.000000e+00> : vector<128xf32>
    %48 = vector.multi_reduction <add>, %45, %cst_33 [1] : vector<128x32xf32> to vector<128xf32>
    %49 = vector.shape_cast %48 : vector<128xf32> to vector<128x1xf32>
    %cst_34 = arith.constant 3.200000e+01 : f32
    %50 = vector.broadcast %cst_34 : f32 to vector<128x1xf32>
    %51 = arith.divf %49, %50 : vector<128x1xf32>
    %52 = vector.broadcast %51 : vector<128x1xf32> to vector<128x32xf32>
    %53 = arith.subf %45, %52 : vector<128x32xf32>
    %54 = arith.mulf %53, %53 : vector<128x32xf32>
    %cst_35 = arith.constant dense<0.000000e+00> : vector<128xf32>
    %55 = vector.multi_reduction <add>, %54, %cst_35 [1] : vector<128x32xf32> to vector<128xf32>
    %56 = vector.shape_cast %55 : vector<128xf32> to vector<128x1xf32>
    %cst_36 = arith.constant 3.200000e+01 : f32
    %57 = vector.broadcast %cst_36 : f32 to vector<128x1xf32>
    %58 = arith.divf %56, %57 : vector<128x1xf32>
    %cst_37 = arith.constant 9.99999974E-6 : f32
    %59 = vector.broadcast %cst_37 : f32 to vector<128x1xf32>
    %60 = arith.addf %58, %59 : vector<128x1xf32>
    %61 = math.rsqrt %60 : vector<128x1xf32>
    %62 = vector.broadcast %61 : vector<128x1xf32> to vector<128x32xf32>
    %63 = arith.mulf %53, %62 : vector<128x32xf32>
    %64 = vector.broadcast %46 : vector<1x32xf32> to vector<128x32xf32>
    %65 = arith.mulf %63, %64 : vector<128x32xf32>
    %66 = vector.broadcast %47 : vector<1x32xf32> to vector<128x32xf32>
    %67 = arith.addf %65, %66 : vector<128x32xf32>
    %cst_38 = arith.constant 0.000000e+00 : f32
    %68 = vector.broadcast %cst_38 : f32 to vector<128x32xf32>
    %69 = arith.maximumf %67, %68 : vector<128x32xf32>
    %c0_39 = arith.constant 0 : index
    %c0_40 = arith.constant 0 : index
    %70 = vector.load %arg11[%c0_39, %c0_40] : memref<32x32xbf16, #tpu.memory_space<vmem>>, vector<32x32xbf16>
    %71 = arith.truncf %69 : vector<128x32xf32> to vector<128x32xbf16>
    %cst_41 = arith.constant dense<0.000000e+00> : vector<128x32xf32>
    %72 = tpu.matmul %71, %70, %cst_41 {dimension_numbers = #tpu.dot_dimension_numbers<[1], [0], [0], [1], [0, 0, 1, 1], [], []>} : vector<128x32xbf16>, vector<32x32xbf16>, vector<128x32xf32> -> vector<128x32xf32>
    %c0_42 = arith.constant 0 : index
    %c0_43 = arith.constant 0 : index
    %73 = vector.load %arg12[%c0_42, %c0_43] : memref<1x32xf32, #tpu.memory_space<vmem>>, vector<1x32xf32>
    %74 = vector.broadcast %73 : vector<1x32xf32> to vector<128x32xf32>
    %75 = arith.addf %72, %74 : vector<128x32xf32>
    %c0_44 = arith.constant 0 : index
    %c0_45 = arith.constant 0 : index
    %76 = vector.load %arg13[%c0_44, %c0_45] : memref<128x32xf32, #tpu.memory_space<vmem>>, vector<128x32xf32>
    tpu.vector_store %arg13[%c0_44, %c0_45], %75 {strides = array<i32>} : memref<128x32xf32, #tpu.memory_space<vmem>>, vector<128x32xf32>,
    return
  }
  func.func @transform_0(%arg0: i32) -> (i32, i32, i32) {
    %c0_i32 = arith.constant 0 : i32
    %c0_i32_0 = arith.constant 0 : i32
    %c0_i32_1 = arith.constant 0 : i32
    return %c0_i32, %arg0, %c0_i32_0 : i32, i32, i32
  }
  func.func @transform_1(%arg0: i32) -> (i32, i32) {
    %c0_i32 = arith.constant 0 : i32
    %c0_i32_0 = arith.constant 0 : i32
    return %arg0, %c0_i32 : i32, i32
  }
  func.func @transform_2(%arg0: i32) -> (i32, i32, i32) {
    %c0_i32 = arith.constant 0 : i32
    %c0_i32_0 = arith.constant 0 : i32
    %c0_i32_1 = arith.constant 0 : i32
    %c0_i32_2 = arith.constant 0 : i32
    return %c0_i32, %c0_i32_0, %c0_i32_1 : i32, i32, i32
  }
  func.func @transform_3(%arg0: i32) -> (i32, i32, i32) {
    %c0_i32 = arith.constant 0 : i32
    %c0_i32_0 = arith.constant 0 : i32
    %c0_i32_1 = arith.constant 0 : i32
    %c0_i32_2 = arith.constant 0 : i32
    return %c0_i32, %c0_i32_0, %c0_i32_1 : i32, i32, i32
  }
  func.func @transform_4(%arg0: i32) -> (i32, i32, i32) {
    %c0_i32 = arith.constant 0 : i32
    %c0_i32_0 = arith.constant 0 : i32
    %c0_i32_1 = arith.constant 0 : i32
    %c0_i32_2 = arith.constant 0 : i32
    return %c0_i32, %c0_i32_0, %c0_i32_1 : i32, i32, i32
  }
  func.func @transform_5(%arg0: i32) -> (i32, i32, i32) {
    %c0_i32 = arith.constant 0 : i32
    %c0_i32_0 = arith.constant 0 : i32
    %c0_i32_1 = arith.constant 0 : i32
    %c0_i32_2 = arith.constant 0 : i32
    return %c0_i32, %c0_i32_0, %c0_i32_1 : i32, i32, i32
  }
  func.func @transform_6(%arg0: i32) -> (i32, i32, i32) {
    %c0_i32 = arith.constant 0 : i32
    %c0_i32_0 = arith.constant 0 : i32
    %c0_i32_1 = arith.constant 0 : i32
    %c0_i32_2 = arith.constant 0 : i32
    return %c0_i32, %c0_i32_0, %c0_i32_1 : i32, i32, i32
  }
  func.func @transform_7(%arg0: i32) -> (i32, i32, i32) {
    %c0_i32 = arith.constant 0 : i32
    %c0_i32_0 = arith.constant 0 : i32
    %c0_i32_1 = arith.constant 0 : i32
    %c0_i32_2 = arith.constant 0 : i32
    return %c0_i32, %c0_i32_0, %c0_i32_1 : i32, i32, i32
  }
  func.func @transform_8(%arg0: i32) -> (i32, i32) {
    %c0_i32 = arith.constant 0 : i32
    %c0_i32_0 = arith.constant 0 : i32
    %c0_i32_1 = arith.constant 0 : i32
    return %c0_i32, %c0_i32_0 : i32, i32
  }
  func.func @transform_9(%arg0: i32) -> (i32, i32) {
    %c0_i32 = arith.constant 0 : i32
    %c0_i32_0 = arith.constant 0 : i32
    %c0_i32_1 = arith.constant 0 : i32
    return %c0_i32, %c0_i32_0 : i32, i32
  }
  func.func @transform_10(%arg0: i32) -> (i32, i32) {
    %c0_i32 = arith.constant 0 : i32
    %c0_i32_0 = arith.constant 0 : i32
    %c0_i32_1 = arith.constant 0 : i32
    return %c0_i32, %c0_i32_0 : i32, i32
  }
  func.func @transform_11(%arg0: i32) -> (i32, i32) {
    %c0_i32 = arith.constant 0 : i32
    %c0_i32_0 = arith.constant 0 : i32
    %c0_i32_1 = arith.constant 0 : i32
    return %c0_i32, %c0_i32_0 : i32, i32
  }
  func.func @transform_12(%arg0: i32) -> (i32, i32) {
    %c0_i32 = arith.constant 0 : i32
    %c0_i32_0 = arith.constant 0 : i32
    return %arg0, %c0_i32 : i32, i32
  }
}

</mosaic_0001>

<bundles_post_ra>
// kernel: tpu_custom_call.1
= control target key start
LH: loop header
LB: loop body
LE: loop exit
PB: predicated region body
PF: predicated region fallthrough
CT: control target
= control target key end

     0   :  { %vm94_vm0 = vcmask 130048   ;;  %vm170_vm1 = vcmask 261120   ;;  %v1358_v52 = vmov 32.0   ;;  %s2308_s2 = inlined_call_operand.vmem [shape: bf16[1,16,32], index: 2, kind: input, shape index: {}]   ;;  %s2309_s0 = inlined_call_operand.vmem [shape: f32[1,128,16], index: 0, kind: input, shape index: {}]   ;;  %s2310_s3 = inlined_call_operand.vmem [shape: f32[1,1,32], index: 3, kind: input, shape index: {}]   ;;  %s2311_s4 = inlined_call_operand.vmem [shape: f32[1,1,32], index: 4, kind: input, shape index: {}]   ;;  %s2312_s5 = inlined_call_operand.vmem [shape: f32[1,1,32], index: 5, kind: input, shape index: {}]   ;;  %s2313_s6 = inlined_call_operand.vmem [shape: bf16[1,32,32], index: 6, kind: input, shape index: {}]   ;;  %s2314_s7 = inlined_call_operand.vmem [shape: f32[1,1,32], index: 7, kind: input, shape index: {}]   ;;  %s2315_s1 = inlined_call_operand.vmem [shape: f32[128,32], index: 1, kind: input, shape index: {}]   ;;  %s2316_s8 = inlined_call_operand.vmem [shape: f32[1,32], index: 8, kind: input, shape index: {}]   ;;  %s2317_s9 = inlined_call_operand.vmem [shape: f32[1,32], index: 9, kind: input, shape index: {}]   ;;  %s2318_s10 = inlined_call_operand.vmem [shape: bf16[32,32], index: 10, kind: input, shape index: {}]   ;;  %s2319_s11 = inlined_call_operand.vmem [shape: f32[1,32], index: 11, kind: input, shape index: {}]   ;;  %s2320_s12 = inlined_call_operand.vmem [shape: f32[128,32], index: 12, kind: output, shape index: {}]  }
   0x1   :  { %v1274_v0 = vld [vmem:[%s2308_s2] sm:$0xff]  ;;  %v59_v2 = vld [vmem:[%s2309_s0 + $0x8] sm:$0xff]  ;;  %v60_v4 = vld [vmem:[%s2309_s0 + $0x10] sm:$0xff]  ;;  %1292 = vrcp.f32 %v1358_v52 }
   0x2   :  { %v58_v1 = vld [vmem:[%s2309_s0] sm:$0xff]  ;;  %126 = vmatpush.bf16.msra.mxu0 %v1274_v0  ;;  %1279 = vmatpush.bf16.msra.mxu3 %v1274_v0  ;;  %v61_v5 = vld [vmem:[%s2309_s0 + $0x18] sm:$0xff]  ;;  %v63_v8 = vld [vmem:[%s2309_s0 + $0x28] sm:$0xff] }
   0x3   :  { %v76_v3 = vpack.c.bf16 %v59_v2, %v58_v1  ;;  %v77_v6 = vpack.c.bf16 %v61_v5, %v60_v4  ;;  %v62_v7 = vld [vmem:[%s2309_s0 + $0x20] sm:$0xff]  ;;  %v64_v10 = vld [vmem:[%s2309_s0 + $0x30] sm:$0xff]  ;;  %v65_v11 = vld [vmem:[%s2309_s0 + $0x38] sm:$0xff] }
   0x4   :  { %v78_v9 = vpack.c.bf16 %v63_v8, %v62_v7  ;;  %v79_v12 = vpack.c.bf16 %v65_v11, %v64_v10  ;;  %v66_v13 = vld [vmem:[%s2309_s0 + $0x40] sm:$0xff]  ;;  %v67_v14 = vld [vmem:[%s2309_s0 + $0x48] sm:$0xff]  ;;  %v72_v16 = vld [vmem:[%s2309_s0 + $0x70] sm:$0xff] }
   0x5   :  { %1234 = vmatmul.msk.bf16.vlgmr.msra.gmra.mxu0 %vm94_vm0, %v76_v3  ;;  %v80_v15 = vpack.c.bf16 %v67_v14, %v66_v13  ;;  %v73_v17 = vld [vmem:[%s2309_s0 + $0x78] sm:$0xff]  ;;  %v68_v19 = vld [vmem:[%s2309_s0 + $0x50] sm:$0xff]  ;;  %v70_v22 = vld [vmem:[%s2309_s0 + $0x60] sm:$0xff] }
   0x6   :  { %v83_v18 = vpack.c.bf16 %v73_v17, %v72_v16  ;;  %v69_v20 = vld [vmem:[%s2309_s0 + $0x58] sm:$0xff]  ;;  %v71_v23 = vld [vmem:[%s2309_s0 + $0x68] sm:$0xff]  ;;  %v1486_v25 = vld [vmem:[%s2310_s3] ss:$0 sm:$0xff] }
   0x7   :  { %v81_v21 = vpack.c.bf16 %v69_v20, %v68_v19  ;;  %v82_v24 = vpack.c.bf16 %v71_v23, %v70_v22  ;;  %v1293_v54 = vpop.eup %1292 }
   0x8   :  { %1241 = vmatmul.msk.bf16.vlgmr.msra.gmra.mxu3 %vm94_vm0, %v83_v18  ;;  %v220_v55 = vmul.f32 32.0, %v1293_v54  ;;  %vm224_vm2 = vweird.f32 %v1293_v54 }
   0xa   :  { %v221_v59 = vsub.f32 1.0, %v220_v55 }
   0xc   :  { %v222_v61 = vmul.f32 %v1293_v54, %v221_v59  ;;  %v1276_v59 = vld [vmem:[%s2313_s6 + $0x8] sm:$0xff] }
   0xd   :  { %642 = vmatpush.bf16.msra.mxu1 %v1276_v59  ;;  %1280 = vmatpush.bf16.msrb.mxu3 %v1276_v59 }
   0xe   :  { %v223_v63 = vadd.f32 %v1293_v54, %v222_v61 }
  0x10   :  { %v1529_v2 = vsel %vm224_vm2, %v1293_v54, %v223_v63 }
  0x15   :  { %1235 = vmatmul.msk.bf16.gmra.mxu0 %vm94_vm0, %v77_v6 }
  0x25   :  { %1236 = vmatmul.msk.bf16.gmra.mxu0 %vm94_vm0, %v78_v9 }
  0x35   :  { %1237 = vmatmul.msk.bf16.gmra.mxu0 %vm94_vm0, %v79_v12 }
  0x45   :  { %1238 = vmatmul.msk.bf16.gmra.mxu0 %vm94_vm0, %v80_v15 }
  0x55   :  { %1239 = vmatmul.msk.bf16.gmra.mxu0 %vm94_vm0, %v81_v21 }
  0x65   :  { %1240 = vmatmul.msk.bf16.gmra.mxu0 %vm94_vm0, %v82_v24 }
  0x82   :  { %v128_v26 = vpop.f32.mrf.mxu0 }
  0x83   :  { %v129_v27 = vadd.f32 %v1486_v25, %v128_v26 }
  0x85   :  { %v171_v28 = vsel %vm170_vm1, %v129_v27, 0.0 }
  0x86   :  { %172 = vadd.xlane.f32.xlu0 %v171_v28 }
  0x8a   :  { %v130_v29 = vpop.f32.mrf.mxu0 }
  0x8b   :  { %v131_v30 = vadd.f32 %v1486_v25, %v130_v29  ;;  %v163_v57 = vpop.f32.mrf.mxu3 }
  0x8d   :  { %v174_v31 = vsel %vm170_vm1, %v131_v30, 0.0 }
  0x8e   :  { %175 = vadd.xlane.f32.xlu0 %v174_v31 }
  0x92   :  { %v133_v32 = vpop.f32.mrf.mxu0 }
  0x93   :  { %v1493_v33 = vadd.f32 %v1486_v25, %v133_v32  ;;  %v165_v0 = vpop.f32.mrf.mxu3 }
  0x94   :  { %v1532_v3 = vadd.f32 %v1486_v25, %v165_v0 }
  0x95   :  { %v177_v34 = vsel %vm170_vm1, %v1493_v33, 0.0 }
  0x96   :  { %178 = vadd.xlane.f32.xlu1 %v177_v34  ;;  %v216_v6 = vsel %vm170_vm1, %v1532_v3, 0.0 }
  0x9a   :  { %v135_v35 = vpop.f32.mrf.mxu0 }
  0x9b   :  { %v1498_v36 = vadd.f32 %v1486_v25, %v135_v35  ;;  %v1583_v35 = vadd.f32 %v1486_v25, %v163_v57 }
  0x9d   :  { %v180_v37 = vsel %vm170_vm1, %v1498_v36, 0.0 }
  0x9e   :  { %181 = vadd.xlane.f32.xlu1 %v180_v37 }
  0xa2   :  { %v138_v38 = vpop.f32.mrf.mxu0 }
  0xa3   :  { %v1503_v39 = vadd.f32 %v1486_v25, %v138_v38 }
  0xa5   :  { %v183_v40 = vsel %vm170_vm1, %v1503_v39, 0.0 }
  0xa6   :  { %184 = vadd.xlane.f32.xlu2 %v183_v40  ;;  %v213_v40 = vsel %vm170_vm1, %v1583_v35, 0.0 }
  0xaa   :  { %v140_v41 = vpop.f32.mrf.mxu0 }
  0xab   :  { %v1508_v42 = vadd.f32 %v1486_v25, %v140_v41 }
  0xad   :  { %v186_v43 = vsel %vm170_vm1, %v1508_v42, 0.0 }
  0xae   :  { %187 = vadd.xlane.f32.xlu2 %v186_v43 }
  0xb2   :  { %v143_v44 = vpop.f32.mrf.mxu0 }
  0xb3   :  { %v1513_v45 = vadd.f32 %v1486_v25, %v143_v44 }
  0xb5   :  { %v189_v46 = vsel %vm170_vm1, %v1513_v45, 0.0 }
  0xb6   :  { %190 = vadd.xlane.f32.xlu2 %v189_v46 }
  0xba   :  { %v145_v47 = vpop.f32.mrf.mxu0 }
  0xbb   :  { %v1547_v13 = vadd.f32 %v1486_v25, %v145_v47 }
  0xbd   :  { %v192_v17 = vsel %vm170_vm1, %v1547_v13, 0.0 }
  0xc2   :  { %v148_v48 = vpop.f32.mrf.mxu0 }
  0xc3   :  { %v1525_v62 = vadd.f32 %v1486_v25, %v148_v48 }
  0xc5   :  { %v195_v1 = vsel %vm170_vm1, %v1525_v62, 0.0 }
  0xca   :  { %v150_v49 = vpop.f32.mrf.mxu0 }
  0xcb   :  { %v1572_v29 = vadd.f32 %v1486_v25, %v150_v49 }
  0xcd   :  { %v198_v32 = vsel %vm170_vm1, %v1572_v29, 0.0 }
  0xd2   :  { %v153_v50 = vpop.f32.mrf.mxu0 }
  0xd3   :  { %v1543_v10 = vadd.f32 %v1486_v25, %v153_v50 }
  0xd5   :  { %v201_v15 = vsel %vm170_vm1, %v1543_v10, 0.0 }
  0xda   :  { %v1517_v51 = vpop.f32.mrf.mxu0 }
  0xdb   :  { %v1597_v46 = vadd.f32 %v1486_v25, %v1517_v51 }
  0xdd   :  { %v204_v48 = vsel %vm170_vm1, %v1597_v46, 0.0 }
  0xe2   :  { %v158_v53 = vpop.f32.mrf.mxu0 }
  0xe3   :  { %v1559_v20 = vadd.f32 %v1486_v25, %v158_v53 }
  0xe5   :  { %v207_v24 = vsel %vm170_vm1, %v1559_v20, 0.0 }
  0xea   :  { %v160_v56 = vpop.f32.mrf.mxu0 }
  0xeb   :  { %v1520_v58 = vadd.f32 %v1486_v25, %v160_v56 }
  0xed   :  { %v210_v60 = vsel %vm170_vm1, %v1520_v58, 0.0 }
  0xee   :  { %211 = vadd.xlane.f32.xlu2 %v210_v60 }
  0xf6   :  { %196 = vadd.xlane.f32.xlu2 %v195_v1 }
  0xf9   :  { %v173_v4 = vpop.xlane.xlu0 %172 }
  0xfa   :  { %v226_v5 = vmul.f32 %v1529_v2, %v173_v4 }
  0xfc   :  { %v1537_v7 = vsub.f32 %v129_v27, %v226_v5 }
  0xfe   :  { %217 = vadd.xlane.f32.xlu2 %v216_v6  ;;  %v258_v8 = vmul.f32 %v1537_v7, %v1537_v7 }
 0x100   :  { %v274_v9 = vsel %vm170_vm1, %v258_v8, 0.0 }
 0x101   :  { %275 = vadd.xlane.f32.xlu0 %v274_v9  ;;  %v176_v11 = vpop.xlane.xlu0 %175 }
 0x102   :  { %v227_v12 = vmul.f32 %v1529_v2, %v176_v11 }
 0x104   :  { %v1549_v14 = vsub.f32 %v131_v30, %v227_v12 }
 0x106   :  { %202 = vadd.xlane.f32.xlu2 %v201_v15  ;;  %v259_v16 = vmul.f32 %v1549_v14, %v1549_v14 }
 0x108   :  { %v277_v18 = vsel %vm170_vm1, %v259_v16, 0.0 }
 0x109   :  { %v179_v19 = vpop.xlane.xlu1 %178  ;;  %193 = vadd.xlane.f32.xlu0 %v192_v17  ;;  %278 = vadd.xlane.f32.xlu1 %v277_v18 }
 0x10a   :  { %v228_v21 = vmul.f32 %v1529_v2, %v179_v19 }
 0x10c   :  { %v1563_v22 = vsub.f32 %v1493_v33, %v228_v21 }
 0x10e   :  { %v260_v23 = vmul.f32 %v1563_v22, %v1563_v22 }
 0x110   :  { %v280_v26 = vsel %vm170_vm1, %v260_v23, 0.0 }
 0x111   :  { %v182_v27 = vpop.xlane.xlu1 %181  ;;  %281 = vadd.xlane.f32.xlu0 %v280_v26  ;;  %208 = vadd.xlane.f32.xlu1 %v207_v24 }
 0x112   :  { %v229_v28 = vmul.f32 %v1529_v2, %v182_v27 }
 0x114   :  { %v1575_v30 = vsub.f32 %v1498_v36, %v229_v28 }
 0x116   :  { %v261_v31 = vmul.f32 %v1575_v30, %v1575_v30 }
 0x118   :  { %v283_v33 = vsel %vm170_vm1, %v261_v31, 0.0 }
 0x119   :  { %v185_v34 = vpop.xlane.xlu2 %184  ;;  %199 = vadd.xlane.f32.xlu0 %v198_v32  ;;  %284 = vadd.xlane.f32.xlu1 %v283_v33 }
 0x11a   :  { %v230_v37 = vmul.f32 %v1529_v2, %v185_v34 }
 0x11c   :  { %v1587_v38 = vsub.f32 %v1503_v39, %v230_v37 }
 0x11e   :  { %v262_v36 = vmul.f32 %v1587_v38, %v1587_v38 }
 0x120   :  { %v286_v41 = vsel %vm170_vm1, %v262_v36, 0.0 }
 0x121   :  { %v188_v43 = vpop.xlane.xlu2 %187  ;;  %287 = vadd.xlane.f32.xlu0 %v286_v41  ;;  %214 = vadd.xlane.f32.xlu1 %v213_v40 }
 0x122   :  { %v231_v44 = vmul.f32 %v1529_v2, %v188_v43 }
 0x124   :  { %v1600_v39 = vsub.f32 %v1508_v42, %v231_v44 }
 0x126   :  { %v263_v47 = vmul.f32 %v1600_v39, %v1600_v39 }
 0x128   :  { %v289_v49 = vsel %vm170_vm1, %v263_v47, 0.0 }
 0x129   :  { %v191_v50 = vpop.xlane.xlu2 %190  ;;  %205 = vadd.xlane.f32.xlu0 %v204_v48  ;;  %290 = vadd.xlane.f32.xlu1 %v289_v49 }
 0x12a   :  { %v232_v52 = vmul.f32 %v1529_v2, %v191_v50 }
 0x12c   :  { %v1609_v53 = vsub.f32 %v1513_v45, %v232_v52 }
 0x12e   :  { %v264_v25 = vmul.f32 %v1609_v53, %v1609_v53 }
 0x130   :  { %v292_v42 = vsel %vm170_vm1, %v264_v25, 0.0 }
 0x131   :  { %293 = vadd.xlane.f32.xlu1 %v292_v42 }
 0x161   :  { %v212_v51 = vpop.xlane.xlu2 %211 }
 0x162   :  { %v239_v54 = vmul.f32 %v1529_v2, %v212_v51 }
 0x164   :  { %v1616_v55 = vsub.f32 %v1520_v58, %v239_v54  ;;  %v1275_v58 = vld [vmem:[%s2313_s6] sm:$0xff] }
 0x165   :  { %643 = vmatpush.bf16.msra.mxu1 %v1275_v58  ;;  %1281 = vmatpush.bf16.msrb.mxu3 %v1275_v58 }
 0x166   :  { %v271_v56 = vmul.f32 %v1616_v55, %v1616_v55 }
 0x168   :  { %v313_v57 = vsel %vm170_vm1, %v271_v56, 0.0 }
 0x169   :  { %314 = vadd.xlane.f32.xlu1 %v313_v57  ;;  %v197_v61 = vpop.xlane.xlu2 %196 }
 0x16a   :  { %v234_v8 = vmul.f32 %v1529_v2, %v197_v61 }
 0x16c   :  { %v1637_v18 = vsub.f32 %v1525_v62, %v234_v8 }
 0x16e   :  { %v266_v33 = vmul.f32 %v1637_v18, %v1637_v18 }
 0x170   :  { %v298_v47 = vsel %vm170_vm1, %v266_v33, 0.0 }
 0x171   :  { %v218_v15 = vpop.xlane.xlu2 %217 }
 0x172   :  { %v241_v31 = vmul.f32 %v1529_v2, %v218_v15 }
 0x174   :  { %v276_v45 = vpop.xlane.xlu0 %275  ;;  %v1654_v43 = vsub.f32 %v1532_v3, %v241_v31  ;;  %v1664_v3 = vld [vmem:[%s2311_s4] ss:$0 sm:$0xff] }
 0x175   :  { %v322_v60 = vmul.f32 %v276_v45, %v1529_v2 }
 0x177   :  { %v338_v63 = vadd.f32 1e-05, %v322_v60 }
 0x179   :  { %1294 = vrsqrt.f32 %v338_v63  ;;  %vm360_vm4 = vweird.f32 %v338_v63 }
 0x17c   :  { %v279_v0 = vpop.xlane.xlu1 %278  ;;  %v194_v1 = vpop.xlane.xlu0 %193 }
 0x17d   :  { %v323_v4 = vmul.f32 %v279_v0, %v1529_v2  ;;  %v233_v5 = vmul.f32 %v1529_v2, %v194_v1 }
 0x17f   :  { %v1295_v6 = vpop.eup %1294  ;;  %v339_v9 = vadd.f32 1e-05, %v323_v4  ;;  %v1632_v11 = vsub.f32 %v1547_v13, %v233_v5 }
 0x180   :  { %v355_v12 = vmul.f32 %v1295_v6, %v338_v63  ;;  %vm361_vm3 = vweird.f32 %v1295_v6 }
 0x181   :  { %1296 = vrsqrt.f32 %v339_v9  ;;  %v265_v16 = vmul.f32 %v1632_v11, %v1632_v11  ;;  %vm362_vm5 = vmor %vm360_vm4, %vm361_vm3  ;;  %vm370_vm7 = vweird.f32 %v339_v9 }
 0x182   :  { %v356_v17 = vmul.f32 %v1295_v6, %v355_v12 }
 0x183   :  { %v295_v19 = vsel %vm170_vm1, %v265_v16, 0.0 }
 0x184   :  { %v357_v21 = vmul.f32 0.5, %v356_v17  ;;  %v209_v23 = vpop.xlane.xlu1 %208  ;;  %296 = vadd.xlane.f32.xlu2 %v295_v19  ;;  %v282_v24 = vpop.xlane.xlu0 %281 }
 0x185   :  { %v238_v26 = vmul.f32 %v1529_v2, %v209_v23  ;;  %v324_v13 = vmul.f32 %v282_v24, %v1529_v2 }
 0x186   :  { %v358_v27 = vsub.f32 1.5, %v357_v21 }
 0x187   :  { %v1297_v28 = vpop.eup %1296  ;;  %v1644_v32 = vsub.f32 %v1559_v20, %v238_v26  ;;  %v1646_v62 = vadd.f32 1e-05, %v324_v13  ;;  %v203_v20 = vpop.xlane.xlu2 %202 }
 0x188   :  { %v359_v34 = vmul.f32 %v1295_v6, %v358_v27  ;;  %v365_v37 = vmul.f32 %v1297_v28, %v339_v9  ;;  %vm371_vm6 = vweird.f32 %v1297_v28  ;;  %v236_v56 = vmul.f32 %v1529_v2, %v203_v20 }
 0x189   :  { %1298 = vrsqrt.f32 %v1646_v62  ;;  %v270_v36 = vmul.f32 %v1644_v32, %v1644_v32  ;;  %vm372_vm8 = vmor %vm370_vm7, %vm371_vm6  ;;  %vm380_vm10 = vweird.f32 %v1646_v62 }
 0x18a   :  { %v363_v40 = vsel %vm362_vm5, %v1295_v6, %v359_v34  ;;  %v366_v41 = vmul.f32 %v1297_v28, %v365_v37  ;;  %v1685_v1 = vsub.f32 %v1543_v10, %v236_v56 }
 0x18b   :  { %v310_v44 = vsel %vm170_vm1, %v270_v36, 0.0  ;;  %v514_v52 = vmul.f32 %v363_v40, %v1537_v7  ;;  %v273_v7 = vmul.f32 %v1654_v43, %v1654_v43 }
 0x18c   :  { %v367_v48 = vmul.f32 0.5, %v366_v41  ;;  %311 = vadd.xlane.f32.xlu0 %v310_v44  ;;  %v285_v49 = vpop.xlane.xlu1 %284  ;;  %299 = vadd.xlane.f32.xlu2 %v298_v47  ;;  %v200_v50 = vpop.xlane.xlu0 %199  ;;  %v268_v24 = vmul.f32 %v1685_v1, %v1685_v1 }
 0x18d   :  { %v325_v25 = vmul.f32 %v285_v49, %v1529_v2  ;;  %v235_v42 = vmul.f32 %v1529_v2, %v200_v50  ;;  %v533_v63 = vmul.f32 %v1664_v3, %v514_v52  ;;  %v319_v5 = vsel %vm170_vm1, %v273_v7, 0.0 }
 0x18e   :  { %v368_v51 = vsub.f32 1.5, %v367_v48 }
 0x18f   :  { %v1299_v54 = vpop.eup %1298  ;;  %v1667_v57 = vadd.f32 1e-05, %v325_v25  ;;  %v1670_v45 = vsub.f32 %v1572_v29, %v235_v42  ;;  %v1682_v29 = vld [vmem:[%s2312_s5] ss:$0 sm:$0xff] }
 0x190   :  { %v369_v59 = vmul.f32 %v1297_v28, %v368_v51  ;;  %v375_v60 = vmul.f32 %v1299_v54, %v1646_v62  ;;  %v552_v10 = vadd.f32 %v1682_v29, %v533_v63  ;;  %vm381_vm9 = vweird.f32 %v1299_v54 }
 0x191   :  { %1300 = vrsqrt.f32 %v1667_v57  ;;  %v267_v61 = vmul.f32 %v1670_v45, %v1670_v45  ;;  %vm1702_vm11 = vmor %vm380_vm10, %vm381_vm9  ;;  %v304_v62 = vsel %vm170_vm1, %v268_v24, 0.0  ;;  %vm390_vm13 = vweird.f32 %v1667_v57 }
 0x192   :  { %v373_v58 = vsel %vm372_vm8, %v1297_v28, %v369_v59  ;;  %v376_v0 = vmul.f32 %v1299_v54, %v375_v60  ;;  %v568_v31 = vmax.f32 %v552_v10, 0.0 }
 0x193   :  { %v515_v4 = vmul.f32 %v373_v58, %v1549_v14  ;;  %v301_v6 = vsel %vm170_vm1, %v267_v61, 0.0 }
 0x194   :  { %v377_v8 = vmul.f32 0.5, %v376_v0  ;;  %v215_v9 = vpop.xlane.xlu1 %214  ;;  %320 = vadd.xlane.f32.xlu2 %v319_v5  ;;  %302 = vadd.xlane.f32.xlu0 %v301_v6  ;;  %v288_v12 = vpop.xlane.xlu0 %287 }
 0x195   :  { %v240_v15 = vmul.f32 %v1529_v2, %v215_v9  ;;  %v326_v16 = vmul.f32 %v288_v12, %v1529_v2  ;;  %v534_v17 = vmul.f32 %v1664_v3, %v515_v4 }
 0x196   :  { %v378_v19 = vsub.f32 1.5, %v377_v8 }
 0x197   :  { %v1301_v14 = vpop.eup %1300  ;;  %v1695_v21 = vsub.f32 %v1583_v35, %v240_v15  ;;  %v342_v23 = vadd.f32 1e-05, %v326_v16  ;;  %v553_v26 = vadd.f32 %v1682_v29, %v534_v17 }
 0x198   :  { %v379_v13 = vmul.f32 %v1299_v54, %v378_v19  ;;  %v385_v27 = vmul.f32 %v1301_v14, %v1667_v57  ;;  %vm391_vm12 = vweird.f32 %v1301_v14 }
 0x199   :  { %1302 = vrsqrt.f32 %v342_v23  ;;  %v272_v35 = vmul.f32 %v1695_v21, %v1695_v21  ;;  %v569_v33 = vmax.f32 %v553_v26, 0.0  ;;  %vm392_vm14 = vmor %vm390_vm13, %vm391_vm12  ;;  %vm400_vm0 = vweird.f32 %v342_v23 }
 0x19a   :  { %v383_v34 = vsel %vm1702_vm11, %v1299_v54, %v379_v13  ;;  %v386_v37 = vmul.f32 %v1301_v14, %v385_v27 }
 0x19b   :  { %v316_v36 = vsel %vm170_vm1, %v272_v35, 0.0  ;;  %v588_v40 = vpack.c.bf16 %v569_v33, %v568_v31  ;;  %v516_v47 = vmul.f32 %v383_v34, %v1563_v22 }
 0x19c   :  { %v387_v41 = vmul.f32 0.5, %v386_v37  ;;  %317 = vadd.xlane.f32.xlu1 %v316_v36  ;;  %v291_v20 = vpop.xlane.xlu1 %290  ;;  %305 = vadd.xlane.f32.xlu0 %v304_v62  ;;  %v206_v44 = vpop.xlane.xlu0 %205 }
 0x19d   :  { %v327_v48 = vmul.f32 %v291_v20, %v1529_v2  ;;  %v237_v49 = vmul.f32 %v1529_v2, %v206_v44  ;;  %1250 = vmatmul.msk.bf16.vlgmr.msra.gmra.mxu1 %vm170_vm1, %v588_v40  ;;  %v535_v56 = vmul.f32 %v1664_v3, %v516_v47 }
 0x19e   :  { %v388_v50 = vsub.f32 1.5, %v387_v41 }
 0x19f   :  { %v1303_v52 = vpop.eup %1302  ;;  %v343_v25 = vadd.f32 1e-05, %v327_v48  ;;  %v1717_v42 = vsub.f32 %v1597_v46, %v237_v49  ;;  %v554_v57 = vadd.f32 %v1682_v29, %v535_v56 }
 0x1a0   :  { %v389_v51 = vmul.f32 %v1301_v14, %v388_v50  ;;  %v395_v54 = vmul.f32 %v1303_v52, %v342_v23  ;;  %vm401_vm15 = vweird.f32 %v1303_v52 }
 0x1a1   :  { %1304 = vrsqrt.f32 %v343_v25  ;;  %v269_v22 = vmul.f32 %v1717_v42, %v1717_v42  ;;  %vm402_vm2 = vmor %vm400_vm0, %vm401_vm15  ;;  %v570_v8 = vmax.f32 %v554_v57, 0.0  ;;  %vm410_vm4 = vweird.f32 %v343_v25 }
 0x1a2   :  { %v393_v7 = vsel %vm392_vm14, %v1301_v14, %v389_v51  ;;  %v396_v59 = vmul.f32 %v1303_v52, %v395_v54 }
 0x1a3   :  { %v517_v60 = vmul.f32 %v393_v7, %v1575_v30  ;;  %v307_v61 = vsel %vm170_vm1, %v269_v22, 0.0 }
 0x1a4   :  { %v397_v63 = vmul.f32 0.5, %v396_v59  ;;  %308 = vadd.xlane.f32.xlu1 %v307_v61  ;;  %v294_v31 = vpop.xlane.xlu1 %293 }
 0x1a5   :  { %v536_v46 = vmul.f32 %v1664_v3, %v517_v60  ;;  %v328_v33 = vmul.f32 %v294_v31, %v1529_v2 }
 0x1a6   :  { %v398_v58 = vsub.f32 1.5, %v397_v63 }
 0x1a7   :  { %v1305_v0 = vpop.eup %1304  ;;  %v555_v4 = vadd.f32 %v1682_v29, %v536_v46  ;;  %v344_v34 = vadd.f32 1e-05, %v328_v33 }
 0x1a8   :  { %v399_v5 = vmul.f32 %v1303_v52, %v398_v58  ;;  %v405_v6 = vmul.f32 %v1305_v0, %v343_v25  ;;  %vm411_vm3 = vweird.f32 %v1305_v0 }
 0x1a9   :  { %v571_v9 = vmax.f32 %v555_v4, 0.0  ;;  %vm412_vm5 = vmor %vm410_vm4, %vm411_vm3  ;;  %1306 = vrsqrt.f32 %v344_v34  ;;  %vm420_vm7 = vweird.f32 %v344_v34 }
 0x1aa   :  { %v403_v30 = vsel %vm402_vm2, %v1303_v52, %v399_v5  ;;  %v406_v12 = vmul.f32 %v1305_v0, %v405_v6 }
 0x1ab   :  { %v589_v15 = vpack.c.bf16 %v571_v9, %v570_v8  ;;  %v518_v17 = vmul.f32 %v403_v30, %v1587_v38 }
 0x1ac   :  { %v407_v16 = vmul.f32 0.5, %v406_v12 }
 0x1ad   :  { %1251 = vmatmul.msk.bf16.gmra.mxu1 %vm170_vm1, %v589_v15  ;;  %v537_v14 = vmul.f32 %v1664_v3, %v518_v17 }
 0x1ae   :  { %v408_v10 = vsub.f32 1.5, %v407_v16 }
 0x1af   :  { %v556_v13 = vadd.f32 %v1682_v29, %v537_v14  ;;  %v1307_v62 = vpop.eup %1306 }
 0x1b0   :  { %v409_v19 = vmul.f32 %v1305_v0, %v408_v10  ;;  %v415_v40 = vmul.f32 %v1307_v62, %v344_v34  ;;  %vm421_vm6 = vweird.f32 %v1307_v62 }
 0x1b1   :  { %v572_v28 = vmax.f32 %v556_v13, 0.0  ;;  %vm422_vm8 = vmor %vm420_vm7, %vm421_vm6 }
 0x1b2   :  { %v413_v23 = vsel %vm412_vm5, %v1305_v0, %v409_v19  ;;  %v416_v41 = vmul.f32 %v1307_v62, %v415_v40 }
 0x1b3   :  { %v519_v24 = vmul.f32 %v413_v23, %v1600_v39 }
 0x1b4   :  { %v417_v48 = vmul.f32 0.5, %v416_v41 }
 0x1b5   :  { %v538_v26 = vmul.f32 %v1664_v3, %v519_v24 }
 0x1b6   :  { %v418_v52 = vsub.f32 1.5, %v417_v48 }
 0x1b7   :  { %v557_v27 = vadd.f32 %v1682_v29, %v538_v26 }
 0x1b8   :  { %v419_v59 = vmul.f32 %v1307_v62, %v418_v52 }
 0x1b9   :  { %v573_v38 = vmax.f32 %v557_v27, 0.0 }
 0x1ba   :  { %v423_v58 = vsel %vm422_vm8, %v1307_v62, %v419_v59 }
 0x1bb   :  { %v590_v35 = vpack.c.bf16 %v573_v38, %v572_v28  ;;  %v520_v30 = vmul.f32 %v423_v58, %v1609_v53  ;;  %v1800_v58 = vld [vmem:[%s2314_s7] ss:$0 sm:$0xff] }
 0x1bd   :  { %1252 = vmatmul.msk.bf16.gmra.mxu1 %vm170_vm1, %v590_v35  ;;  %v539_v13 = vmul.f32 %v1664_v3, %v520_v30 }
 0x1bf   :  { %v558_v41 = vadd.f32 %v1682_v29, %v539_v13 }
 0x1dc   :  { %v315_v37 = vpop.xlane.xlu1 %314 }
 0x1dd   :  { %v335_v36 = vmul.f32 %v315_v37, %v1529_v2 }
 0x1df   :  { %v351_v39 = vadd.f32 1e-05, %v335_v36 }
 0x1e1   :  { %1308 = vrsqrt.f32 %v351_v39  ;;  %vm490_vm12 = vweird.f32 %v351_v39 }
 0x1e7   :  { %v1738_v20 = vpop.eup %1308 }
 0x1e8   :  { %v485_v49 = vmul.f32 %v1738_v20, %v351_v39  ;;  %vm491_vm10 = vweird.f32 %v1738_v20 }
 0x1e9   :  { %vm492_vm14 = vmor %vm490_vm12, %vm491_vm10 }
 0x1ea   :  { %v486_v25 = vmul.f32 %v1738_v20, %v485_v49 }
 0x1ec   :  { %v487_v60 = vmul.f32 0.5, %v486_v25 }
 0x1ee   :  { %v488_v0 = vsub.f32 1.5, %v487_v60 }
 0x1f0   :  { %v489_v16 = vmul.f32 %v1738_v20, %v488_v0 }
 0x1f2   :  { %v493_v27 = vsel %vm492_vm14, %v1738_v20, %v489_v16 }
 0x1f3   :  { %v527_v62 = vmul.f32 %v493_v27, %v1616_v55 }
 0x1f7   :  { %v297_v44 = vpop.xlane.xlu2 %296 }
 0x1f8   :  { %v329_v47 = vmul.f32 %v297_v44, %v1529_v2 }
 0x1fa   :  { %v345_v50 = vadd.f32 1e-05, %v329_v47 }
 0x1fc   :  { %1310 = vrsqrt.f32 %v345_v50  ;;  %vm430_vm11 = vweird.f32 %v345_v50 }
 0x1ff   :  { %v300_v51 = vpop.xlane.xlu2 %299  ;;  %v312_v54 = vpop.xlane.xlu0 %311 }
 0x200   :  { %v330_v22 = vmul.f32 %v300_v51, %v1529_v2  ;;  %v334_v56 = vmul.f32 %v312_v54, %v1529_v2  ;;  %v546_v54 = vmul.f32 %v1664_v3, %v527_v62 }
 0x202   :  { %v1311_v7 = vpop.eup %1310  ;;  %v346_v61 = vadd.f32 1e-05, %v330_v22  ;;  %v1745_v63 = vadd.f32 1e-05, %v334_v56 }
 0x203   :  { %v425_v46 = vmul.f32 %v1311_v7, %v345_v50  ;;  %vm431_vm9 = vweird.f32 %v1311_v7 }
 0x204   :  { %1312 = vrsqrt.f32 %v346_v61  ;;  %vm432_vm13 = vmor %vm430_vm11, %vm431_vm9  ;;  %vm440_vm2 = vweird.f32 %v346_v61  ;;  %vm480_vm4 = vweird.f32 %v1745_v63 }
 0x205   :  { %v426_v57 = vmul.f32 %v1311_v7, %v425_v46  ;;  %1314 = vrsqrt.f32 %v1745_v63  ;;  %v574_v46 = vmax.f32 %v558_v41, 0.0 }
 0x207   :  { %v427_v4 = vmul.f32 0.5, %v426_v57  ;;  %v321_v5 = vpop.xlane.xlu2 %320  ;;  %v303_v6 = vpop.xlane.xlu0 %302 }
 0x208   :  { %v337_v8 = vmul.f32 %v321_v5, %v1529_v2  ;;  %v331_v9 = vmul.f32 %v303_v6, %v1529_v2 }
 0x209   :  { %v428_v12 = vsub.f32 1.5, %v427_v4 }
 0x20a   :  { %v1751_v15 = vpop.eup %1312  ;;  %v1755_v17 = vadd.f32 1e-05, %v337_v8  ;;  %v1757_v10 = vadd.f32 1e-05, %v331_v9  ;;  %v565_v9 = vadd.f32 %v1682_v29, %v546_v54 }
 0x20b   :  { %v1315_v19 = vpop.eup %1314  ;;  %v429_v14 = vmul.f32 %v1311_v7, %v428_v12  ;;  %v435_v23 = vmul.f32 %v1751_v15, %v346_v61  ;;  %vm441_vm15 = vweird.f32 %v1751_v15 }
 0x20c   :  { %v475_v53 = vmul.f32 %v1315_v19, %v1745_v63  ;;  %1316 = vrsqrt.f32 %v1755_v17  ;;  %vm481_vm0 = vweird.f32 %v1315_v19  ;;  %vm1783_vm3 = vmor %vm440_vm2, %vm441_vm15  ;;  %vm450_vm8 = vweird.f32 %v1757_v10 }
 0x20d   :  { %v433_v24 = vsel %vm432_vm13, %v1311_v7, %v429_v14  ;;  %v436_v26 = vmul.f32 %v1751_v15, %v435_v23  ;;  %1318 = vrsqrt.f32 %v1757_v10  ;;  %vm482_vm5 = vmor %vm480_vm4, %vm481_vm0  ;;  %vm510_vm9 = vweird.f32 %v1755_v17 }
 0x20e   :  { %v521_v28 = vmul.f32 %v433_v24, %v1632_v11  ;;  %v476_v38 = vmul.f32 %v1315_v19, %v475_v53  ;;  %v581_v62 = vmax.f32 %v565_v9, 0.0 }
 0x20f   :  { %v437_v35 = vmul.f32 0.5, %v436_v26  ;;  %v318_v31 = vpop.xlane.xlu1 %317  ;;  %v306_v33 = vpop.xlane.xlu0 %305 }
 0x210   :  { %v477_v34 = vmul.f32 0.5, %v476_v38  ;;  %v336_v37 = vmul.f32 %v318_v31, %v1529_v2  ;;  %v332_v36 = vmul.f32 %v306_v33, %v1529_v2  ;;  %v540_v39 = vmul.f32 %v1664_v3, %v521_v28 }
 0x211   :  { %v438_v40 = vsub.f32 1.5, %v437_v35 }
 0x212   :  { %v1773_v20 = vpop.eup %1316  ;;  %v478_v11 = vsub.f32 1.5, %v477_v34  ;;  %v1775_v44 = vadd.f32 1e-05, %v336_v37  ;;  %v1777_v47 = vadd.f32 1e-05, %v332_v36  ;;  %v559_v50 = vadd.f32 %v1682_v29, %v540_v39 }
 0x213   :  { %v1319_v48 = vpop.eup %1318  ;;  %v439_v49 = vmul.f32 %v1751_v15, %v438_v40  ;;  %v505_v55 = vmul.f32 %v1773_v20, %v1755_v17  ;;  %vm511_vm7 = vweird.f32 %v1773_v20 }
 0x214   :  { %v479_v25 = vmul.f32 %v1315_v19, %v478_v11  ;;  %v445_v51 = vmul.f32 %v1319_v48, %v1757_v10  ;;  %1320 = vrsqrt.f32 %v1775_v44  ;;  %v575_v57 = vmax.f32 %v559_v50, 0.0  ;;  %vm1824_vm11 = vmor %vm510_vm9, %vm511_vm7  ;;  %v43_v50 = vld [vmem:[%s2315_s1 + $0x8] sm:$0xff] }
 0x215   :  { %v506_v22 = vmul.f32 %v1773_v20, %v505_v55  ;;  %1322 = vrsqrt.f32 %v1777_v47  ;;  %v443_v56 = vsel %vm1783_vm3, %v1751_v15, %v439_v49  ;;  %vm451_vm6 = vweird.f32 %v1319_v48 }
 0x216   :  { %v483_v7 = vsel %vm482_vm5, %v1315_v19, %v479_v25  ;;  %v446_v59 = vmul.f32 %v1319_v48, %v445_v51  ;;  %v522_v5 = vmul.f32 %v443_v56, %v1637_v18  ;;  %v591_v8 = vpack.c.bf16 %v575_v57, %v574_v46  ;;  %v42_v19 = vld [vmem:[%s2315_s1] sm:$0xff]  ;;  %vm452_vm10 = vmor %vm450_vm8, %vm451_vm6 }
 0x217   :  { %v526_v60 = vmul.f32 %v483_v7, %v1644_v32  ;;  %v507_v61 = vmul.f32 0.5, %v506_v22  ;;  %v309_v63 = vpop.xlane.xlu1 %308  ;;  %vm500_vm14 = vweird.f32 %v1775_v44  ;;  %vm460_vm0 = vweird.f32 %v1777_v47 }
 0x218   :  { %v447_v0 = vmul.f32 0.5, %v446_v59  ;;  %v333_v4 = vmul.f32 %v309_v63, %v1529_v2  ;;  %1253 = vmatmul.msk.bf16.gmra.mxu1 %vm170_vm1, %v591_v8  ;;  %v541_v28 = vmul.f32 %v1664_v3, %v522_v5 }
 0x219   :  { %v508_v6 = vsub.f32 1.5, %v507_v61  ;;  %v545_v32 = vmul.f32 %v1664_v3, %v526_v60 }
 0x21a   :  { %v1321_v30 = vpop.eup %1320  ;;  %v448_v12 = vsub.f32 1.5, %v447_v0  ;;  %v1806_v15 = vadd.f32 1e-05, %v333_v4  ;;  %v645_v16 = vpop.f32.mrf.mxu1  ;;  %v560_v11 = vadd.f32 %v1682_v29, %v541_v28 }
 0x21b   :  { %v1323_v14 = vpop.eup %1322  ;;  %v509_v23 = vmul.f32 %v1773_v20, %v508_v6  ;;  %v495_v18 = vmul.f32 %v1321_v30, %v1775_v44  ;;  %v646_v53 = vadd.f32 %v1800_v58, %v645_v16  ;;  %v564_v10 = vadd.f32 %v1682_v29, %v545_v32 }
 0x21c   :  { %v449_v24 = vmul.f32 %v1319_v48, %v448_v12  ;;  %v455_v26 = vmul.f32 %v1323_v14, %v1777_v47  ;;  %1324 = vrsqrt.f32 %v1806_v15  ;;  %vm501_vm12 = vweird.f32 %v1321_v30 }
 0x21d   :  { %v496_v13 = vmul.f32 %v1321_v30, %v495_v18  ;;  %v1821_v27 = vadd.f32 %v646_v53, %v42_v19  ;;  %v513_v33 = vsel %vm1824_vm11, %v1773_v20, %v509_v23  ;;  %v580_v39 = vmax.f32 %v564_v10, 0.0  ;;  %vm502_vm15 = vmor %vm500_vm14, %vm501_vm12 }
 0x21e   :  { %v453_v35 = vsel %vm452_vm10, %v1319_v48, %v449_v24  ;;  %v456_v31 = vmul.f32 %v1323_v14, %v455_v26  ;;  %v529_v49 = vmul.f32 %v513_v33, %v1654_v43  ;;  %vm461_vm13 = vweird.f32 %v1323_v14 }
 0x21f   :  { %v523_v17 = vmul.f32 %v453_v35, %v1670_v45  ;;  %v497_v34 = vmul.f32 0.5, %v496_v13  ;;  %v703_v37 = vsel %vm170_vm1, %v1821_v27, 0.0  ;;  %v594_v45 = vpack.c.bf16 %v581_v62, %v580_v39  ;;  %vm462_vm2 = vmor %vm460_vm0, %vm461_vm13  ;;  %v45_v13 = vld [vmem:[%s2315_s1 + $0x18] sm:$0xff]  ;;  %v47_v39 = vld [vmem:[%s2315_s1 + $0x28] sm:$0xff] }
 0x220   :  { %v457_v36 = vmul.f32 0.5, %v456_v31  ;;  %704 = vadd.xlane.f32.xlu2 %v703_v37  ;;  %v576_v59 = vmax.f32 %v560_v11, 0.0  ;;  %v548_v63 = vmul.f32 %v1664_v3, %v529_v49  ;;  %vm470_vm4 = vweird.f32 %v1806_v15 }
 0x221   :  { %v498_v40 = vsub.f32 1.5, %v497_v34  ;;  %v542_v41 = vmul.f32 %v1664_v3, %v523_v17  ;;  %1256 = vmatmul.msk.bf16.vlgmr.msrb.gmra.mxu3 %vm170_vm1, %v594_v45  ;;  %v46_v17 = vld [vmem:[%s2315_s1 + $0x20] sm:$0xff] }
 0x222   :  { %v1325_v48 = vpop.eup %1324  ;;  %v458_v20 = vsub.f32 1.5, %v457_v36  ;;  %v647_v55 = vpop.f32.mrf.mxu1  ;;  %v567_v9 = vadd.f32 %v1682_v29, %v548_v63 }
 0x223   :  { %v499_v52 = vmul.f32 %v1321_v30, %v498_v40  ;;  %v465_v25 = vmul.f32 %v1325_v48, %v1806_v15  ;;  %v648_v51 = vadd.f32 %v1800_v58, %v647_v55  ;;  %v561_v43 = vadd.f32 %v1682_v29, %v542_v41  ;;  %v48_v55 = vld [vmem:[%s2315_s1 + $0x30] sm:$0xff] }
 0x224   :  { %v459_v54 = vmul.f32 %v1323_v14, %v458_v20  ;;  %vm471_vm3 = vweird.f32 %v1325_v48  ;;  %v583_v23 = vmax.f32 %v567_v9, 0.0 }
 0x225   :  { %v503_v22 = vsel %vm502_vm15, %v1321_v30, %v499_v52  ;;  %v466_v56 = vmul.f32 %v1325_v48, %v465_v25  ;;  %v1847_v7 = vadd.f32 %v648_v51, %v43_v50  ;;  %v577_v61 = vmax.f32 %v561_v43, 0.0  ;;  %vm472_vm5 = vmor %vm470_vm4, %vm471_vm3 }
 0x226   :  { %v528_v44 = vmul.f32 %v503_v22, %v1695_v21  ;;  %v463_v60 = vsel %vm462_vm2, %v1323_v14, %v459_v54  ;;  %v44_v21 = vld [vmem:[%s2315_s1 + $0x10] sm:$0xff] }
 0x227   :  { %v467_v46 = vmul.f32 0.5, %v466_v56  ;;  %v706_v47 = vsel %vm170_vm1, %v1847_v7, 0.0  ;;  %v592_v57 = vpack.c.bf16 %v577_v61, %v576_v59  ;;  %v524_v4 = vmul.f32 %v463_v60, %v1685_v1  ;;  %v49_v56 = vld [vmem:[%s2315_s1 + $0x38] sm:$0xff] }
 0x228   :  { %707 = vadd.xlane.f32.xlu0 %v706_v47  ;;  %v547_v0 = vmul.f32 %v1664_v3, %v528_v44 }
 0x229   :  { %v468_v5 = vsub.f32 1.5, %v467_v46  ;;  %1254 = vmatmul.msk.bf16.gmra.mxu1 %vm170_vm1, %v592_v57  ;;  %v543_v19 = vmul.f32 %v1664_v3, %v524_v4  ;;  %v50_v4 = vld [vmem:[%s2315_s1 + $0x40] sm:$0xff] }
 0x22a   :  { %v650_v6 = vpop.f32.mrf.mxu1  ;;  %v566_v8 = vadd.f32 %v1682_v29, %v547_v0 }
 0x22b   :  { %v469_v30 = vmul.f32 %v1325_v48, %v468_v5  ;;  %v651_v32 = vadd.f32 %v1800_v58, %v650_v6  ;;  %v562_v15 = vadd.f32 %v1682_v29, %v543_v19 }
 0x22c   :  { %v582_v1 = vmax.f32 %v566_v8, 0.0 }
 0x22d   :  { %v473_v12 = vsel %vm472_vm5, %v1325_v48, %v469_v30  ;;  %v687_v16 = vadd.f32 %v651_v32, %v44_v21  ;;  %v578_v31 = vmax.f32 %v562_v15, 0.0 }
 0x22e   :  { %v525_v14 = vmul.f32 %v473_v12, %v1717_v42  ;;  %v595_v53 = vpack.c.bf16 %v583_v23, %v582_v1 }
 0x22f   :  { %v709_v18 = vsel %vm170_vm1, %v687_v16, 0.0 }
 0x230   :  { %710 = vadd.xlane.f32.xlu1 %v709_v18  ;;  %v544_v24 = vmul.f32 %v1664_v3, %v525_v14  ;;  %v51_v18 = vld [vmem:[%s2315_s1 + $0x48] sm:$0xff] }
 0x231   :  { %1257 = vmatmul.msk.bf16.gmra.mxu3 %vm170_vm1, %v595_v53 }
 0x232   :  { %v652_v26 = vpop.f32.mrf.mxu1  ;;  %v563_v28 = vadd.f32 %v1682_v29, %v544_v24 }
 0x233   :  { %v653_v38 = vadd.f32 %v1800_v58, %v652_v26 }
 0x234   :  { %v579_v42 = vmax.f32 %v563_v28, 0.0 }
 0x235   :  { %v688_v35 = vadd.f32 %v653_v38, %v45_v13  ;;  %v54_v38 = vld [vmem:[%s2315_s1 + $0x60] sm:$0xff] }
 0x236   :  { %v593_v33 = vpack.c.bf16 %v579_v42, %v578_v31 }
 0x237   :  { %v712_v10 = vsel %vm170_vm1, %v688_v35, 0.0 }
 0x238   :  { %713 = vadd.xlane.f32.xlu2 %v712_v10 }
 0x239   :  { %1255 = vmatmul.msk.bf16.gmra.mxu1 %vm170_vm1, %v593_v33 }
 0x23a   :  { %v655_v3 = vpop.f32.mrf.mxu1 }
 0x23b   :  { %v656_v29 = vadd.f32 %v1800_v58, %v655_v3 }
 0x23d   :  { %v1880_v34 = vadd.f32 %v656_v29, %v46_v17  ;;  %v52_v29 = vld [vmem:[%s2315_s1 + $0x50] sm:$0xff] }
 0x23f   :  { %v715_v37 = vsel %vm170_vm1, %v1880_v34, 0.0 }
 0x240   :  { %716 = vadd.xlane.f32.xlu0 %v715_v37 }
 0x242   :  { %v657_v36 = vpop.f32.mrf.mxu1 }
 0x243   :  { %v658_v62 = vadd.f32 %v1800_v58, %v657_v36 }
 0x245   :  { %v1888_v40 = vadd.f32 %v658_v62, %v47_v39 }
 0x247   :  { %v718_v41 = vsel %vm170_vm1, %v1888_v40, 0.0 }
 0x248   :  { %719 = vadd.xlane.f32.xlu1 %v718_v41 }
 0x293   :  { %v705_v11 = vpop.xlane.xlu2 %704 }
 0x294   :  { %v751_v48 = vmul.f32 %v705_v11, %v1529_v2 }
 0x295   :  { %v660_v20 = vpop.f32.mrf.mxu1 }
 0x296   :  { %v1894_v49 = vsub.f32 %v1821_v27, %v751_v48  ;;  %v661_v50 = vadd.f32 %v1800_v58, %v660_v20 }
 0x298   :  { %v783_v45 = vmul.f32 %v1894_v49, %v1894_v49  ;;  %v1903_v25 = vadd.f32 %v661_v50, %v48_v55  ;;  %v57_v55 = vld [vmem:[%s2315_s1 + $0x78] sm:$0xff] }
 0x29a   :  { %v799_v52 = vsel %vm170_vm1, %v783_v45, 0.0  ;;  %v721_v27 = vsel %vm170_vm1, %v1903_v25, 0.0 }
 0x29b   :  { %800 = vadd.xlane.f32.xlu2 %v799_v52  ;;  %v708_v51 = vpop.xlane.xlu0 %707  ;;  %722 = vadd.xlane.f32.xlu1 %v721_v27 }
 0x29c   :  { %v752_v54 = vmul.f32 %v708_v51, %v1529_v2 }
 0x29d   :  { %v662_v22 = vpop.f32.mrf.mxu1 }
 0x29e   :  { %v1909_v43 = vsub.f32 %v1847_v7, %v752_v54  ;;  %v663_v44 = vadd.f32 %v1800_v58, %v662_v22  ;;  %v53_v54 = vld [vmem:[%s2315_s1 + $0x58] sm:$0xff] }
 0x2a0   :  { %v784_v59 = vmul.f32 %v1909_v43, %v1909_v43  ;;  %v1918_v61 = vadd.f32 %v663_v44, %v49_v56  ;;  %v56_v44 = vld [vmem:[%s2315_s1 + $0x70] sm:$0xff] }
 0x2a2   :  { %v802_v60 = vsel %vm170_vm1, %v784_v59, 0.0  ;;  %v724_v7 = vsel %vm170_vm1, %v1918_v61, 0.0 }
 0x2a3   :  { %v711_v63 = vpop.xlane.xlu1 %710  ;;  %803 = vadd.xlane.f32.xlu0 %v802_v60  ;;  %725 = vadd.xlane.f32.xlu2 %v724_v7 }
 0x2a4   :  { %v753_v46 = vmul.f32 %v711_v63, %v1529_v2  ;;  %v675_v57 = vpop.f32.mrf.mxu3 }
 0x2a5   :  { %v676_v24 = vadd.f32 %v1800_v58, %v675_v57 }
 0x2a6   :  { %v1923_v47 = vsub.f32 %v687_v16, %v753_v46  ;;  %v665_v0 = vpop.f32.mrf.mxu1  ;;  %v55_v16 = vld [vmem:[%s2315_s1 + $0x68] sm:$0xff] }
 0x2a7   :  { %v666_v6 = vadd.f32 %v1800_v58, %v665_v0  ;;  %v1966_v33 = vadd.f32 %v676_v24, %v54_v38 }
 0x2a8   :  { %v785_v5 = vmul.f32 %v1923_v47, %v1923_v47 }
 0x2a9   :  { %v1932_v9 = vadd.f32 %v666_v6, %v50_v4  ;;  %v739_v39 = vsel %vm170_vm1, %v1966_v33, 0.0  ;;  %v1278_v6 = vld [vmem:[%s2318_s10 + $0x8] sm:$0xff] }
 0x2aa   :  { %v805_v21 = vsel %vm170_vm1, %v785_v5, 0.0  ;;  %1167 = vmatpush.bf16.msra.mxu2 %v1278_v6  ;;  %1282 = vmatpush.bf16.msra.mxu3 %v1278_v6 }
 0x2ab   :  { %v714_v8 = vpop.xlane.xlu2 %713  ;;  %806 = vadd.xlane.f32.xlu0 %v805_v21  ;;  %v727_v32 = vsel %vm170_vm1, %v1932_v9, 0.0 }
 0x2ac   :  { %v754_v30 = vmul.f32 %v714_v8, %v1529_v2  ;;  %728 = vadd.xlane.f32.xlu2 %v727_v32  ;;  %v677_v12 = vpop.f32.mrf.mxu3  ;;  %v1277_v32 = vld [vmem:[%s2318_s10] sm:$0xff] }
 0x2ad   :  { %v678_v19 = vadd.f32 %v1800_v58, %v677_v12 }
 0x2ae   :  { %v1937_v1 = vsub.f32 %v688_v35, %v754_v30  ;;  %v667_v14 = vpop.f32.mrf.mxu1  ;;  %1168 = vmatpush.bf16.msra.mxu2 %v1277_v32  ;;  %1283 = vmatpush.bf16.msra.mxu3 %v1277_v32 }
 0x2af   :  { %v668_v53 = vadd.f32 %v1800_v58, %v667_v14  ;;  %v1951_v26 = vadd.f32 %v678_v19, %v55_v16 }
 0x2b0   :  { %v786_v23 = vmul.f32 %v1937_v1, %v1937_v1 }
 0x2b1   :  { %v1953_v13 = vadd.f32 %v668_v53, %v51_v18  ;;  %v742_v35 = vsel %vm170_vm1, %v1951_v26, 0.0 }
 0x2b2   :  { %v808_v15 = vsel %vm170_vm1, %v786_v23, 0.0 }
 0x2b3   :  { %809 = vadd.xlane.f32.xlu1 %v808_v15  ;;  %v717_v28 = vpop.xlane.xlu0 %716  ;;  %v730_v31 = vsel %vm170_vm1, %v1953_v13, 0.0 }
 0x2b4   :  { %v755_v42 = vmul.f32 %v717_v28, %v1529_v2  ;;  %743 = vadd.xlane.f32.xlu2 %v742_v35  ;;  %731 = vadd.xlane.f32.xlu0 %v730_v31  ;;  %v680_v3 = vpop.f32.mrf.mxu3 }
 0x2b5   :  { %v681_v27 = vadd.f32 %v1800_v58, %v680_v3 }
 0x2b6   :  { %v1964_v10 = vsub.f32 %v1880_v34, %v755_v42  ;;  %v670_v17 = vpop.f32.mrf.mxu1 }
 0x2b7   :  { %v671_v36 = vadd.f32 %v1800_v58, %v670_v17 }
 0x2b8   :  { %v787_v37 = vmul.f32 %v1964_v10, %v1964_v10 }
 0x2b9   :  { %v1976_v34 = vadd.f32 %v671_v36, %v52_v29 }
 0x2ba   :  { %v811_v41 = vsel %vm170_vm1, %v787_v37, 0.0 }
 0x2bb   :  { %v720_v62 = vpop.xlane.xlu1 %719  ;;  %740 = vadd.xlane.f32.xlu1 %v739_v39  ;;  %v733_v48 = vsel %vm170_vm1, %v1976_v34, 0.0 }
 0x2bc   :  { %v756_v11 = vmul.f32 %v720_v62, %v1529_v2  ;;  %734 = vadd.xlane.f32.xlu2 %v733_v48  ;;  %812 = vadd.xlane.f32.xlu0 %v811_v41  ;;  %v682_v45 = vpop.f32.mrf.mxu3 }
 0x2bd   :  { %v683_v50 = vadd.f32 %v1800_v58, %v682_v45 }
 0x2be   :  { %v1983_v20 = vsub.f32 %v1888_v40, %v756_v11  ;;  %v672_v52 = vpop.f32.mrf.mxu1 }
 0x2bf   :  { %v673_v40 = vadd.f32 %v1800_v58, %v672_v52  ;;  %v1997_v56 = vadd.f32 %v683_v50, %v57_v55  ;;  %v2008_v58 = vadd.f32 %v681_v27, %v56_v44  ;;  %v2046_v52 = vld [vmem:[%s2316_s8] ss:$0 sm:$0xff] }
 0x2c0   :  { %v788_v51 = vmul.f32 %v1983_v20, %v1983_v20 }
 0x2c1   :  { %v1999_v59 = vadd.f32 %v673_v40, %v53_v54  ;;  %v748_v60 = vsel %vm170_vm1, %v1997_v56, 0.0  ;;  %v745_v46 = vsel %vm170_vm1, %v2008_v58, 0.0 }
 0x2c2   :  { %v814_v22 = vsel %vm170_vm1, %v788_v51, 0.0 }
 0x2c3   :  { %815 = vadd.xlane.f32.xlu1 %v814_v22  ;;  %v736_v63 = vsel %vm170_vm1, %v1999_v59, 0.0 }
 0x2c4   :  { %749 = vadd.xlane.f32.xlu2 %v748_v60  ;;  %737 = vadd.xlane.f32.xlu0 %v736_v63 }
 0x2cb   :  { %746 = vadd.xlane.f32.xlu1 %v745_v46 }
 0x30e   :  { %v801_v7 = vpop.xlane.xlu2 %800  ;;  %v723_v4 = vpop.xlane.xlu1 %722 }
 0x30f   :  { %v847_v57 = vmul.f32 %v801_v7, %v1529_v2  ;;  %v757_v5 = vmul.f32 %v723_v4, %v1529_v2  ;;  %v2058_v7 = vld [vmem:[%s2317_s9] ss:$0 sm:$0xff] }
 0x311   :  { %v863_v0 = vadd.f32 1e-05, %v847_v57  ;;  %v2018_v21 = vsub.f32 %v1903_v25, %v757_v5 }
 0x313   :  { %1326 = vrsqrt.f32 %v863_v0  ;;  %v789_v8 = vmul.f32 %v2018_v21, %v2018_v21  ;;  %vm885_vm7 = vweird.f32 %v863_v0 }
 0x315   :  { %v817_v16 = vsel %vm170_vm1, %v789_v8, 0.0 }
 0x316   :  { %v804_v30 = vpop.xlane.xlu0 %803  ;;  %v726_v14 = vpop.xlane.xlu2 %725  ;;  %818 = vadd.xlane.f32.xlu0 %v817_v16 }
 0x317   :  { %v848_v12 = vmul.f32 %v804_v30, %v1529_v2  ;;  %v758_v18 = vmul.f32 %v726_v14, %v1529_v2 }
 0x319   :  { %v1327_v19 = vpop.eup %1326  ;;  %v864_v25 = vadd.f32 1e-05, %v848_v12  ;;  %v2029_v24 = vsub.f32 %v1918_v61, %v758_v18 }
 0x31a   :  { %v880_v23 = vmul.f32 %v1327_v19, %v863_v0  ;;  %vm886_vm6 = vweird.f32 %v1327_v19 }
 0x31b   :  { %1328 = vrsqrt.f32 %v864_v25  ;;  %v790_v28 = vmul.f32 %v2029_v24, %v2029_v24  ;;  %vm887_vm8 = vmor %vm885_vm7, %vm886_vm6  ;;  %vm895_vm10 = vweird.f32 %v864_v25 }
 0x31c   :  { %v881_v53 = vmul.f32 %v1327_v19, %v880_v23 }
 0x31d   :  { %v820_v31 = vsel %vm170_vm1, %v790_v28, 0.0 }
 0x31e   :  { %v882_v15 = vmul.f32 0.5, %v881_v53  ;;  %v807_v38 = vpop.xlane.xlu0 %806  ;;  %821 = vadd.xlane.f32.xlu1 %v820_v31 }
 0x31f   :  { %v849_v42 = vmul.f32 %v807_v38, %v1529_v2  ;;  %v729_v17 = vpop.xlane.xlu2 %728 }
 0x320   :  { %v883_v35 = vsub.f32 1.5, %v882_v15  ;;  %v759_v61 = vmul.f32 %v729_v17, %v1529_v2 }
 0x321   :  { %v1329_v3 = vpop.eup %1328  ;;  %v865_v29 = vadd.f32 1e-05, %v849_v42 }
 0x322   :  { %v884_v37 = vmul.f32 %v1327_v19, %v883_v35  ;;  %v890_v36 = vmul.f32 %v1329_v3, %v864_v25  ;;  %v2037_v41 = vsub.f32 %v1932_v9, %v759_v61  ;;  %vm896_vm9 = vweird.f32 %v1329_v3 }
 0x323   :  { %1330 = vrsqrt.f32 %v865_v29  ;;  %vm897_vm11 = vmor %vm895_vm10, %vm896_vm9  ;;  %vm905_vm13 = vweird.f32 %v865_v29 }
 0x324   :  { %v888_v39 = vsel %vm887_vm8, %v1327_v19, %v884_v37  ;;  %v891_v62 = vmul.f32 %v1329_v3, %v890_v36  ;;  %v791_v45 = vmul.f32 %v2037_v41, %v2037_v41 }
 0x325   :  { %v1039_v55 = vmul.f32 %v888_v39, %v1894_v49 }
 0x326   :  { %v892_v11 = vmul.f32 0.5, %v891_v62  ;;  %v810_v48 = vpop.xlane.xlu1 %809  ;;  %v823_v54 = vsel %vm170_vm1, %v791_v45, 0.0 }
 0x327   :  { %v850_v50 = vmul.f32 %v810_v48, %v1529_v2  ;;  %v744_v27 = vpop.xlane.xlu2 %743  ;;  %824 = vadd.xlane.f32.xlu2 %v823_v54  ;;  %v732_v22 = vpop.xlane.xlu0 %731  ;;  %v1058_v46 = vmul.f32 %v2046_v52, %v1039_v55 }
 0x328   :  { %v893_v51 = vsub.f32 1.5, %v892_v11  ;;  %v764_v60 = vmul.f32 %v744_v27, %v1529_v2  ;;  %v760_v63 = vmul.f32 %v732_v22, %v1529_v2 }
 0x329   :  { %v1331_v9 = vpop.eup %1330  ;;  %v2049_v40 = vadd.f32 1e-05, %v850_v50 }
 0x32a   :  { %v894_v44 = vmul.f32 %v1329_v3, %v893_v51  ;;  %v900_v49 = vmul.f32 %v1331_v9, %v865_v29  ;;  %v2061_v4 = vsub.f32 %v1951_v26, %v764_v60  ;;  %v2065_v6 = vsub.f32 %v1953_v13, %v760_v63 }
 0x32b   :  { %1332 = vrsqrt.f32 %v2049_v40  ;;  %v1077_v26 = vadd.f32 %v2058_v7, %v1058_v46  ;;  %vm906_vm12 = vweird.f32 %v1331_v9  ;;  %vm915_vm0 = vweird.f32 %v2049_v40 }
 0x32c   :  { %v898_v57 = vsel %vm897_vm11, %v1329_v3, %v894_v44  ;;  %v901_v0 = vmul.f32 %v1331_v9, %v900_v49  ;;  %v796_v32 = vmul.f32 %v2061_v4, %v2061_v4  ;;  %v792_v16 = vmul.f32 %v2065_v6, %v2065_v6  ;;  %vm907_vm14 = vmor %vm905_vm13, %vm906_vm12 }
 0x32d   :  { %v1040_v5 = vmul.f32 %v898_v57, %v1909_v43  ;;  %v1093_v31 = vmax.f32 %v1077_v26, 0.0 }
 0x32e   :  { %v902_v8 = vmul.f32 0.5, %v901_v0  ;;  %v741_v30 = vpop.xlane.xlu1 %740  ;;  %v838_v43 = vsel %vm170_vm1, %v796_v32, 0.0  ;;  %v826_v18 = vsel %vm170_vm1, %v792_v16, 0.0 }
 0x32f   :  { %v763_v12 = vmul.f32 %v741_v30, %v1529_v2  ;;  %v1059_v19 = vmul.f32 %v2046_v52, %v1040_v5  ;;  %839 = vadd.xlane.f32.xlu2 %v838_v43  ;;  %v735_v23 = vpop.xlane.xlu2 %734  ;;  %v813_v53 = vpop.xlane.xlu0 %812  ;;  %827 = vadd.xlane.f32.xlu0 %v826_v18 }
 0x330   :  { %v903_v14 = vsub.f32 1.5, %v902_v8  ;;  %v761_v42 = vmul.f32 %v735_v23, %v1529_v2  ;;  %v851_v35 = vmul.f32 %v813_v53, %v1529_v2 }
 0x331   :  { %v1333_v13 = vpop.eup %1332  ;;  %v2076_v25 = vsub.f32 %v1966_v33, %v763_v12  ;;  %v1078_v15 = vadd.f32 %v2058_v7, %v1059_v19 }
 0x332   :  { %v904_v28 = vmul.f32 %v1331_v9, %v903_v14  ;;  %v910_v38 = vmul.f32 %v1333_v13, %v2049_v40  ;;  %v2086_v36 = vsub.f32 %v1976_v34, %v761_v42  ;;  %v867_v61 = vadd.f32 1e-05, %v851_v35 }
 0x333   :  { %v795_v33 = vmul.f32 %v2076_v25, %v2076_v25  ;;  %v1094_v3 = vmax.f32 %v1078_v15, 0.0  ;;  %vm916_vm15 = vweird.f32 %v1333_v13 }
 0x334   :  { %v908_v17 = vsel %vm907_vm14, %v1331_v9, %v904_v28  ;;  %v911_v37 = vmul.f32 %v1333_v13, %v910_v38  ;;  %v793_v48 = vmul.f32 %v2086_v36, %v2086_v36  ;;  %1334 = vrsqrt.f32 %v867_v61  ;;  %vm917_vm2 = vmor %vm915_vm0, %vm916_vm15 }
 0x335   :  { %v835_v29 = vsel %vm170_vm1, %v795_v33, 0.0  ;;  %v1113_v39 = vpack.c.bf16 %v1094_v3, %v1093_v31  ;;  %v1041_v45 = vmul.f32 %v908_v17, %v1923_v47  ;;  %vm925_vm4 = vweird.f32 %v867_v61 }
 0x336   :  { %v912_v62 = vmul.f32 0.5, %v911_v37  ;;  %836 = vadd.xlane.f32.xlu1 %v835_v29  ;;  %v816_v11 = vpop.xlane.xlu1 %815  ;;  %v829_v34 = vsel %vm170_vm1, %v793_v48, 0.0 }
 0x337   :  { %v852_v55 = vmul.f32 %v816_v11, %v1529_v2  ;;  %1266 = vmatmul.msk.bf16.vlgmr.msra.gmra.mxu2 %vm170_vm1, %v1113_v39  ;;  %v750_v54 = vpop.xlane.xlu2 %749  ;;  %v738_v9 = vpop.xlane.xlu0 %737  ;;  %830 = vadd.xlane.f32.xlu0 %v829_v34  ;;  %v1060_v44 = vmul.f32 %v2046_v52, %v1041_v45 }
 0x338   :  { %v913_v50 = vsub.f32 1.5, %v912_v62  ;;  %v766_v22 = vmul.f32 %v750_v54, %v1529_v2  ;;  %v762_v47 = vmul.f32 %v738_v9, %v1529_v2 }
 0x339   :  { %v868_v51 = vadd.f32 1e-05, %v852_v55 }
 0x33a   :  { %v914_v27 = vmul.f32 %v1333_v13, %v913_v50  ;;  %v2100_v60 = vsub.f32 %v1997_v56, %v766_v22  ;;  %v2103_v63 = vsub.f32 %v1999_v59, %v762_v47  ;;  %v1335_v46 = vpop.eup %1334  ;;  %v1079_v56 = vadd.f32 %v2058_v7, %v1060_v44 }
 0x33b   :  { %1336 = vrsqrt.f32 %v868_v51  ;;  %v920_v40 = vmul.f32 %v1335_v46, %v867_v61  ;;  %vm926_vm3 = vweird.f32 %v1335_v46  ;;  %vm935_vm7 = vweird.f32 %v868_v51 }
 0x33c   :  { %v918_v49 = vsel %vm917_vm2, %v1333_v13, %v914_v27  ;;  %v798_v5 = vmul.f32 %v2100_v60, %v2100_v60  ;;  %v794_v8 = vmul.f32 %v2103_v63, %v2103_v63  ;;  %v1095_v23 = vmax.f32 %v1079_v56, 0.0  ;;  %vm927_vm5 = vmor %vm925_vm4, %vm926_vm3 }
 0x33d   :  { %v1042_v57 = vmul.f32 %v918_v49, %v1937_v1  ;;  %v921_v12 = vmul.f32 %v1335_v46, %v920_v40 }
 0x33e   :  { %v747_v0 = vpop.xlane.xlu1 %746  ;;  %v844_v59 = vsel %vm170_vm1, %v798_v5, 0.0  ;;  %v832_v16 = vsel %vm170_vm1, %v794_v8, 0.0 }
 0x33f   :  { %v765_v30 = vmul.f32 %v747_v0, %v1529_v2  ;;  %v1061_v32 = vmul.f32 %v2046_v52, %v1042_v57  ;;  %833 = vadd.xlane.f32.xlu1 %v832_v16  ;;  %v922_v14 = vmul.f32 0.5, %v921_v12  ;;  %845 = vadd.xlane.f32.xlu0 %v844_v59 }
 0x341   :  { %v1337_v1 = vpop.eup %1336  ;;  %v2116_v19 = vsub.f32 %v2008_v58, %v765_v30  ;;  %v1080_v26 = vadd.f32 %v2058_v7, %v1061_v32  ;;  %v923_v53 = vsub.f32 1.5, %v922_v14 }
 0x342   :  { %v930_v43 = vmul.f32 %v1337_v1, %v868_v51  ;;  %vm936_vm6 = vweird.f32 %v1337_v1 }
 0x343   :  { %v797_v13 = vmul.f32 %v2116_v19, %v2116_v19  ;;  %v1096_v18 = vmax.f32 %v1080_v26, 0.0  ;;  %v924_v42 = vmul.f32 %v1335_v46, %v923_v53  ;;  %vm937_vm8 = vmor %vm935_vm7, %vm936_vm6 }
 0x344   :  { %v931_v15 = vmul.f32 %v1337_v1, %v930_v43 }
 0x345   :  { %v841_v28 = vsel %vm170_vm1, %v797_v13, 0.0  ;;  %v1114_v38 = vpack.c.bf16 %v1096_v18, %v1095_v23  ;;  %v928_v35 = vsel %vm927_vm5, %v1335_v46, %v924_v42 }
 0x346   :  { %v932_v58 = vmul.f32 0.5, %v931_v15  ;;  %842 = vadd.xlane.f32.xlu2 %v841_v28  ;;  %v1043_v31 = vmul.f32 %v928_v35, %v1964_v10 }
 0x347   :  { %1267 = vmatmul.msk.bf16.gmra.mxu2 %vm170_vm1, %v1114_v38 }
 0x348   :  { %v933_v33 = vsub.f32 1.5, %v932_v58  ;;  %v1062_v17 = vmul.f32 %v2046_v52, %v1043_v31 }
 0x34a   :  { %v934_v3 = vmul.f32 %v1337_v1, %v933_v33  ;;  %v1081_v39 = vadd.f32 %v2058_v7, %v1062_v17 }
 0x34c   :  { %v938_v37 = vsel %vm937_vm8, %v1337_v1, %v934_v3  ;;  %v1097_v11 = vmax.f32 %v1081_v39, 0.0 }
 0x34d   :  { %v1044_v29 = vmul.f32 %v938_v37, %v1983_v20 }
 0x34f   :  { %v1063_v61 = vmul.f32 %v2046_v52, %v1044_v29 }
 0x351   :  { %v1082_v62 = vadd.f32 %v2058_v7, %v1063_v61 }
 0x353   :  { %v1098_v48 = vmax.f32 %v1082_v62, 0.0 }
 0x355   :  { %v1115_v45 = vpack.c.bf16 %v1098_v48, %v1097_v11 }
 0x357   :  { %1268 = vmatmul.msk.bf16.gmra.mxu2 %vm170_vm1, %v1115_v45 }
 0x389   :  { %v819_v10 = vpop.xlane.xlu0 %818 }
 0x38a   :  { %v853_v55 = vmul.f32 %v819_v10, %v1529_v2 }
 0x38c   :  { %v869_v50 = vadd.f32 1e-05, %v853_v55 }
 0x38e   :  { %1338 = vrsqrt.f32 %v869_v50  ;;  %vm945_vm10 = vweird.f32 %v869_v50 }
 0x391   :  { %v822_v34 = vpop.xlane.xlu1 %821 }
 0x392   :  { %v854_v51 = vmul.f32 %v822_v34, %v1529_v2 }
 0x394   :  { %v1339_v20 = vpop.eup %1338  ;;  %v870_v54 = vadd.f32 1e-05, %v854_v51 }
 0x395   :  { %v940_v9 = vmul.f32 %v1339_v20, %v869_v50  ;;  %vm946_vm9 = vweird.f32 %v1339_v20 }
 0x396   :  { %1340 = vrsqrt.f32 %v870_v54  ;;  %vm947_vm11 = vmor %vm945_vm10, %vm946_vm9  ;;  %vm955_vm13 = vweird.f32 %v870_v54 }
 0x397   :  { %v941_v27 = vmul.f32 %v1339_v20, %v940_v9 }
 0x399   :  { %v942_v22 = vmul.f32 0.5, %v941_v27 }
 0x39a   :  { %v825_v47 = vpop.xlane.xlu2 %824 }
 0x39b   :  { %v855_v44 = vmul.f32 %v825_v47, %v1529_v2  ;;  %v943_v49 = vsub.f32 1.5, %v942_v22 }
 0x39c   :  { %v1341_v46 = vpop.eup %1340 }
 0x39d   :  { %v871_v57 = vadd.f32 1e-05, %v855_v44  ;;  %v944_v40 = vmul.f32 %v1339_v20, %v943_v49  ;;  %v950_v0 = vmul.f32 %v1341_v46, %v870_v54  ;;  %vm956_vm12 = vweird.f32 %v1341_v46 }
 0x39e   :  { %vm957_vm14 = vmor %vm955_vm13, %vm956_vm12 }
 0x39f   :  { %1342 = vrsqrt.f32 %v871_v57  ;;  %v948_v5 = vsel %vm947_vm11, %v1339_v20, %v944_v40  ;;  %v951_v8 = vmul.f32 %v1341_v46, %v950_v0  ;;  %vm965_vm0 = vweird.f32 %v871_v57 }
 0x3a0   :  { %v1045_v56 = vmul.f32 %v948_v5, %v2018_v21 }
 0x3a1   :  { %v952_v30 = vmul.f32 0.5, %v951_v8 }
 0x3a2   :  { %v840_v32 = vpop.xlane.xlu2 %839  ;;  %v828_v59 = vpop.xlane.xlu0 %827  ;;  %v1064_v53 = vmul.f32 %v2046_v52, %v1045_v56 }
 0x3a3   :  { %v860_v12 = vmul.f32 %v840_v32, %v1529_v2  ;;  %v953_v16 = vsub.f32 1.5, %v952_v30  ;;  %v856_v1 = vmul.f32 %v828_v59, %v1529_v2 }
 0x3a4   :  { %v1083_v31 = vadd.f32 %v2058_v7, %v1064_v53 }
 0x3a5   :  { %v1343_v26 = vpop.eup %1342  ;;  %v876_v14 = vadd.f32 1e-05, %v860_v12  ;;  %v954_v43 = vmul.f32 %v1341_v46, %v953_v16  ;;  %v2136_v23 = vadd.f32 1e-05, %v856_v1 }
 0x3a6   :  { %v960_v13 = vmul.f32 %v1343_v26, %v871_v57  ;;  %vm966_vm15 = vweird.f32 %v1343_v26  ;;  %v1099_v48 = vmax.f32 %v1083_v31, 0.0 }
 0x3a7   :  { %1344 = vrsqrt.f32 %v876_v14  ;;  %v958_v21 = vsel %vm957_vm14, %v1341_v46, %v954_v43  ;;  %vm967_vm2 = vmor %vm965_vm0, %vm966_vm15  ;;  %vm1015_vm5 = vweird.f32 %v876_v14  ;;  %vm975_vm7 = vweird.f32 %v2136_v23 }
 0x3a8   :  { %v961_v15 = vmul.f32 %v1343_v26, %v960_v13  ;;  %1346 = vrsqrt.f32 %v2136_v23  ;;  %v1046_v28 = vmul.f32 %v958_v21, %v2029_v24 }
 0x3a9   :  { %v837_v18 = vpop.xlane.xlu1 %836 }
 0x3aa   :  { %v859_v38 = vmul.f32 %v837_v18, %v1529_v2  ;;  %v962_v42 = vmul.f32 0.5, %v961_v15  ;;  %v831_v35 = vpop.xlane.xlu0 %830  ;;  %v1065_v33 = vmul.f32 %v2046_v52, %v1046_v28 }
 0x3ab   :  { %v857_v17 = vmul.f32 %v831_v35, %v1529_v2 }
 0x3ac   :  { %v2142_v58 = vadd.f32 1e-05, %v859_v38  ;;  %v963_v3 = vsub.f32 1.5, %v962_v42  ;;  %v1084_v29 = vadd.f32 %v2058_v7, %v1065_v33 }
 0x3ad   :  { %v1345_v37 = vpop.eup %1344  ;;  %v2149_v62 = vadd.f32 1e-05, %v857_v17 }
 0x3ae   :  { %1348 = vrsqrt.f32 %v2142_v58  ;;  %v1347_v24 = vpop.eup %1346  ;;  %v964_v61 = vmul.f32 %v1343_v26, %v963_v3  ;;  %v1010_v39 = vmul.f32 %v1345_v37, %v876_v14  ;;  %v1100_v45 = vmax.f32 %v1084_v29, 0.0 }
 0x3af   :  { %v970_v11 = vmul.f32 %v1347_v24, %v2136_v23  ;;  %1350 = vrsqrt.f32 %v2149_v62  ;;  %vm1016_vm3 = vweird.f32 %v1345_v37  ;;  %vm976_vm4 = vweird.f32 %v1347_v24 }
 0x3b0   :  { %v1011_v10 = vmul.f32 %v1345_v37, %v1010_v39  ;;  %v968_v55 = vsel %vm967_vm2, %v1343_v26, %v964_v61  ;;  %v1116_v34 = vpack.c.bf16 %v1100_v45, %v1099_v48  ;;  %vm1017_vm6 = vmor %vm1015_vm5, %vm1016_vm3  ;;  %vm1005_vm10 = vweird.f32 %v2142_v58 }
 0x3b1   :  { %v971_v50 = vmul.f32 %v1347_v24, %v970_v11  ;;  %v1047_v47 = vmul.f32 %v968_v55, %v2037_v41  ;;  %v2167_v41 = vld [vmem:[%s2319_s11] ss:$0 sm:$0xff]  ;;  %vm977_vm8 = vmor %vm975_vm7, %vm976_vm4  ;;  %vm985_vm13 = vweird.f32 %v2149_v62 }
 0x3b2   :  { %v1012_v51 = vmul.f32 0.5, %v1011_v10  ;;  %v834_v20 = vpop.xlane.xlu1 %833  ;;  %v846_v22 = vpop.xlane.xlu0 %845  ;;  %1269 = vmatmul.msk.bf16.gmra.mxu2 %vm170_vm1, %v1116_v34 }
 0x3b3   :  { %v972_v9 = vmul.f32 0.5, %v971_v50  ;;  %v858_v27 = vmul.f32 %v834_v20, %v1529_v2  ;;  %v862_v46 = vmul.f32 %v846_v22, %v1529_v2  ;;  %v1066_v26 = vmul.f32 %v2046_v52, %v1047_v47 }
 0x3b4   :  { %v1349_v54 = vpop.eup %1348  ;;  %v1013_v44 = vsub.f32 1.5, %v1012_v51 }
 0x3b5   :  { %v1000_v49 = vmul.f32 %v1349_v54, %v2142_v58  ;;  %v973_v57 = vsub.f32 1.5, %v972_v9  ;;  %v2158_v40 = vadd.f32 1e-05, %v858_v27  ;;  %v2160_v0 = vpop.eup %1350  ;;  %v2162_v30 = vadd.f32 1e-05, %v862_v46 }
 0x3b6   :  { %v1014_v5 = vmul.f32 %v1345_v37, %v1013_v44  ;;  %v980_v56 = vmul.f32 %v2160_v0, %v2149_v62  ;;  %vm1006_vm9 = vweird.f32 %v1349_v54  ;;  %vm986_vm12 = vweird.f32 %v2160_v0 }
 0x3b7   :  { %v1001_v8 = vmul.f32 %v1349_v54, %v1000_v49  ;;  %v974_v32 = vmul.f32 %v1347_v24, %v973_v57  ;;  %1352 = vrsqrt.f32 %v2158_v40  ;;  %vm1007_vm11 = vmor %vm1005_vm10, %vm1006_vm9  ;;  %v1085_v31 = vadd.f32 %v2058_v7, %v1066_v26 }
 0x3b8   :  { %v1018_v59 = vsel %vm1017_vm6, %v1345_v37, %v1014_v5  ;;  %1354 = vrsqrt.f32 %v2162_v30  ;;  %v981_v13 = vmul.f32 %v2160_v0, %v980_v56  ;;  %vm2201_vm14 = vmor %vm985_vm13, %vm986_vm12  ;;  %vm995_vm2 = vweird.f32 %v2158_v40 }
 0x3b9   :  { %v843_v12 = vpop.xlane.xlu2 %842  ;;  %v1002_v16 = vmul.f32 0.5, %v1001_v8  ;;  %v1052_v14 = vmul.f32 %v1018_v59, %v2061_v4  ;;  %v978_v43 = vsel %vm977_vm8, %v1347_v24, %v974_v32  ;;  %v1101_v55 = vmax.f32 %v1085_v31, 0.0 }
 0x3ba   :  { %v1170_v1 = vpop.f32.mrf.mxu2  ;;  %v1048_v23 = vmul.f32 %v978_v43, %v2065_v6  ;;  %v861_v53 = vmul.f32 %v843_v12, %v1529_v2  ;;  %v982_v15 = vmul.f32 0.5, %v981_v13  ;;  %vm1035_vm4 = vweird.f32 %v2162_v30 }
 0x3bb   :  { %v1003_v18 = vsub.f32 1.5, %v1002_v16  ;;  %v1171_v21 = vadd.f32 %v2167_v41, %v1170_v1  ;;  %v1071_v28 = vmul.f32 %v2046_v52, %v1052_v14 }
 0x3bc   :  { %v2184_v42 = vadd.f32 1e-05, %v861_v53  ;;  %v1067_v4 = vmul.f32 %v2046_v52, %v1048_v23  ;;  %v983_v2 = vsub.f32 1.5, %v982_v15 }
 0x3bd   :  { %v1004_v38 = vmul.f32 %v1349_v54, %v1003_v18  ;;  %1210 = vst.msk [vmem:[%s2320_s12] sm:$0xff] %vm170_vm1, %v1171_v21  ;;  %v1353_v6 = vpop.eup %1352  ;;  %v1090_v29 = vadd.f32 %v2058_v7, %v1071_v28 }
 0x3be   :  { %v1355_v58 = vpop.eup %1354  ;;  %v990_v33 = vmul.f32 %v1353_v6, %v2158_v40  ;;  %1356 = vrsqrt.f32 %v2184_v42  ;;  %v984_v17 = vmul.f32 %v2160_v0, %v983_v2  ;;  %v1086_v11 = vadd.f32 %v2058_v7, %v1067_v4 }
 0x3bf   :  { %v1008_v35 = vsel %vm1007_vm11, %v1349_v54, %v1004_v38  ;;  %v1030_v37 = vmul.f32 %v1355_v58, %v2162_v30  ;;  %vm996_vm15 = vweird.f32 %v1353_v6  ;;  %vm1036_vm0 = vweird.f32 %v1355_v58 }
 0x3c0   :  { %v1051_v3 = vmul.f32 %v1008_v35, %v2076_v25  ;;  %v991_v61 = vmul.f32 %v1353_v6, %v990_v33  ;;  %v988_v25 = vsel %vm2201_vm14, %v2160_v0, %v984_v17  ;;  %v1102_v50 = vmax.f32 %v1086_v11, 0.0  ;;  %vm997_vm3 = vmor %vm995_vm2, %vm996_vm15 }
 0x3c1   :  { %v1031_v45 = vmul.f32 %v1355_v58, %v1030_v37  ;;  %v1049_v54 = vmul.f32 %v988_v25, %v2086_v36  ;;  %v1106_v49 = vmax.f32 %v1090_v29, 0.0  ;;  %vm1037_vm5 = vmor %vm1035_vm4, %vm1036_vm0  ;;  %vm1025_vm7 = vweird.f32 %v2184_v42 }
 0x3c2   :  { %v1172_v39 = vpop.f32.mrf.mxu2  ;;  %v1070_v48 = vmul.f32 %v2046_v52, %v1051_v3  ;;  %v992_v10 = vmul.f32 0.5, %v991_v61  ;;  %v1117_v27 = vpack.c.bf16 %v1102_v50, %v1101_v55 }
 0x3c3   :  { %v1173_v62 = vadd.f32 %v2167_v41, %v1172_v39  ;;  %v1032_v51 = vmul.f32 0.5, %v1031_v45  ;;  %v1068_v32 = vmul.f32 %v2046_v52, %v1049_v54 }
 0x3c4   :  { %v1089_v34 = vadd.f32 %v2058_v7, %v1070_v48  ;;  %v1357_v20 = vpop.eup %1356  ;;  %v993_v9 = vsub.f32 1.5, %v992_v10  ;;  %1270 = vmatmul.msk.bf16.gmra.mxu2 %vm170_vm1, %v1117_v27 }
 0x3c5   :  { %1211 = vst.msk [vmem:[%s2320_s12 + $0x8] sm:$0xff] %vm170_vm1, %v1173_v62  ;;  %v1033_v22 = vsub.f32 1.5, %v1032_v51  ;;  %v1020_v47 = vmul.f32 %v1357_v20, %v2184_v42  ;;  %vm1026_vm6 = vweird.f32 %v1357_v20  ;;  %v1087_v26 = vadd.f32 %v2058_v7, %v1068_v32 }
 0x3c6   :  { %v1105_v44 = vmax.f32 %v1089_v34, 0.0  ;;  %v994_v46 = vmul.f32 %v1353_v6, %v993_v9  ;;  %vm1027_vm8 = vmor %vm1025_vm7, %vm1026_vm6 }
 0x3c7   :  { %v1034_v57 = vmul.f32 %v1355_v58, %v1033_v22  ;;  %v1021_v0 = vmul.f32 %v1357_v20, %v1020_v47  ;;  %v1103_v53 = vmax.f32 %v1087_v26, 0.0 }
 0x3c8   :  { %v1119_v36 = vpack.c.bf16 %v1106_v49, %v1105_v44  ;;  %v998_v5 = vsel %vm997_vm3, %v1353_v6, %v994_v46 }
 0x3c9   :  { %v1050_v56 = vmul.f32 %v998_v5, %v2103_v63  ;;  %v1038_v12 = vsel %vm1037_vm5, %v1355_v58, %v1034_v57  ;;  %v1022_v59 = vmul.f32 0.5, %v1021_v0 }
 0x3ca   :  { %v1175_v8 = vpop.f32.mrf.mxu2  ;;  %1272 = vmatmul.msk.bf16.vlgmr.msra.gmra.mxu3 %vm170_vm1, %v1119_v36  ;;  %v1054_v16 = vmul.f32 %v1038_v12, %v2100_v60 }
 0x3cb   :  { %v1176_v40 = vadd.f32 %v2167_v41, %v1175_v8  ;;  %v1023_v1 = vsub.f32 1.5, %v1022_v59  ;;  %v1069_v30 = vmul.f32 %v2046_v52, %v1050_v56 }
 0x3cc   :  { %v1073_v43 = vmul.f32 %v2046_v52, %v1054_v16 }
 0x3cd   :  { %1212 = vst.msk [vmem:[%s2320_s12 + $0x10] sm:$0xff] %vm170_vm1, %v1176_v40  ;;  %v1024_v63 = vmul.f32 %v1357_v20, %v1023_v1  ;;  %v1088_v14 = vadd.f32 %v2058_v7, %v1069_v30 }
 0x3ce   :  { %v1092_v38 = vadd.f32 %v2058_v7, %v1073_v43 }
 0x3cf   :  { %v1028_v60 = vsel %vm1027_vm8, %v1357_v20, %v1024_v63  ;;  %v1104_v13 = vmax.f32 %v1088_v14, 0.0 }
 0x3d0   :  { %v1053_v23 = vmul.f32 %v1028_v60, %v2116_v19  ;;  %v1108_v19 = vmax.f32 %v1092_v38, 0.0 }
 0x3d1   :  { %v1118_v15 = vpack.c.bf16 %v1104_v13, %v1103_v53 }
 0x3d2   :  { %v1177_v18 = vpop.f32.mrf.mxu2  ;;  %v1072_v28 = vmul.f32 %v2046_v52, %v1053_v23 }
 0x3d3   :  { %v1178_v21 = vadd.f32 %v2167_v41, %v1177_v18 }
 0x3d4   :  { %v1091_v42 = vadd.f32 %v2058_v7, %v1072_v28  ;;  %1271 = vmatmul.msk.bf16.gmra.mxu2 %vm170_vm1, %v1118_v15 }
 0x3d5   :  { %1213 = vst.msk [vmem:[%s2320_s12 + $0x18] sm:$0xff] %vm170_vm1, %v1178_v21 }
 0x3d6   :  { %v1107_v4 = vmax.f32 %v1091_v42, 0.0 }
 0x3d8   :  { %v1120_v2 = vpack.c.bf16 %v1108_v19, %v1107_v4 }
 0x3da   :  { %v1180_v6 = vpop.f32.mrf.mxu2  ;;  %1273 = vmatmul.msk.bf16.gmra.mxu3 %vm170_vm1, %v1120_v2 }
 0x3db   :  { %v1181_v58 = vadd.f32 %v2167_v41, %v1180_v6 }
 0x3dd   :  { %1214 = vst.msk [vmem:[%s2320_s12 + $0x20] sm:$0xff] %vm170_vm1, %v1181_v58 }
 0x3e2   :  { %v1182_v52 = vpop.f32.mrf.mxu2 }
 0x3e3   :  { %v1183_v35 = vadd.f32 %v2167_v41, %v1182_v52 }
 0x3e5   :  { %1215 = vst.msk [vmem:[%s2320_s12 + $0x28] sm:$0xff] %vm170_vm1, %v1183_v35 }
 0x435   :  { %v1185_v7 = vpop.f32.mrf.mxu2 }
 0x436   :  { %v1186_v33 = vadd.f32 %v2167_v41, %v1185_v7 }
 0x438   :  { %1216 = vst.msk [vmem:[%s2320_s12 + $0x30] sm:$0xff] %vm170_vm1, %v1186_v33 }
 0x43d   :  { %v1187_v31 = vpop.f32.mrf.mxu2 }
 0x43e   :  { %v1188_v3 = vadd.f32 %v2167_v41, %v1187_v31 }
 0x440   :  { %1217 = vst.msk [vmem:[%s2320_s12 + $0x38] sm:$0xff] %vm170_vm1, %v1188_v3 }
 0x447   :  { %v1190_v17 = vpop.f32.mrf.mxu2 }
 0x448   :  { %v1191_v37 = vadd.f32 %v2167_v41, %v1190_v17 }
 0x44a   :  { %1218 = vst.msk [vmem:[%s2320_s12 + $0x40] sm:$0xff] %vm170_vm1, %v1191_v37 }
 0x44d   :  { %v1200_v29 = vpop.f32.mrf.mxu3 }
 0x44e   :  { %v1201_v24 = vadd.f32 %v2167_v41, %v1200_v29 }
 0x44f   :  { %v1192_v61 = vpop.f32.mrf.mxu2 }
 0x450   :  { %1222 = vst.msk [vmem:[%s2320_s12 + $0x60] sm:$0xff] %vm170_vm1, %v1201_v24  ;;  %v1193_v39 = vadd.f32 %v2167_v41, %v1192_v61 }
 0x452   :  { %1219 = vst.msk [vmem:[%s2320_s12 + $0x48] sm:$0xff] %vm170_vm1, %v1193_v39 }
 0x455   :  { %v1202_v11 = vpop.f32.mrf.mxu3 }
 0x456   :  { %v1203_v48 = vadd.f32 %v2167_v41, %v1202_v11 }
 0x457   :  { %v1195_v25 = vpop.f32.mrf.mxu2 }
 0x458   :  { %1223 = vst.msk [vmem:[%s2320_s12 + $0x68] sm:$0xff] %vm170_vm1, %v1203_v48  ;;  %v1196_v45 = vadd.f32 %v2167_v41, %v1195_v25 }
 0x45a   :  { %1220 = vst.msk [vmem:[%s2320_s12 + $0x50] sm:$0xff] %vm170_vm1, %v1196_v45 }
 0x45d   :  { %v1205_v62 = vpop.f32.mrf.mxu3 }
 0x45e   :  { %v1206_v10 = vadd.f32 %v2167_v41, %v1205_v62 }
 0x45f   :  { %v1197_v55 = vpop.f32.mrf.mxu2 }
 0x460   :  { %1224 = vst.msk [vmem:[%s2320_s12 + $0x70] sm:$0xff] %vm170_vm1, %v1206_v10  ;;  %v1198_v50 = vadd.f32 %v2167_v41, %v1197_v55 }
 0x462   :  { %1221 = vst.msk [vmem:[%s2320_s12 + $0x58] sm:$0xff] %vm170_vm1, %v1198_v50 }
 0x465   :  { %v1207_v34 = vpop.f32.mrf.mxu3 }
 0x466   :  { %v1208_v51 = vadd.f32 %v2167_v41, %v1207_v34 }
 0x468   :  { %1225 = vst.msk [vmem:[%s2320_s12 + $0x78] sm:$0xff] %vm170_vm1, %v1208_v51 }

</bundles_post_ra>
